<compile_context>
chip_gen: v5e
topology: v5e:2x2
jax: 0.10.0
libtpu: 0.0.40
codegen_flags: <defaults>
</compile_context>

<pallas_src>
import functools
import math

import jax
import jax.numpy as jnp
from jax import lax
from jax.experimental import pallas as pl
from jax.experimental.pallas import tpu as pltpu


def _attention_kernel(x_ref, wqkv_ref, wproj_ref, bproj_ref, o_ref,
                      qkv_ref, ctx_ref, *, num_heads, batch_tile, padded_seq,
                      true_seq, compute_dtype, approx_recip):
    _, C = x_ref.shape                      # x block: (Bt*Np, C)
    Np, N, Bt, H = padded_seq, true_seq, batch_tile, num_heads
    hd = C // H

    # ---- qkv projection: one tall (Bt*Np, C) x (C, 3C) MXU matmul, f32 accumulate.
    # Stored immediately into the compute_dtype scratch ref (bounded live ranges).
    qkv_ref[...] = jnp.dot(x_ref[...], wqkv_ref[...],
                           preferred_element_type=jnp.float32).astype(compute_dtype)

    # Additive key mask for padded token positions (hoisted out of all loops).
    if Np > N:
        col = lax.broadcasted_iota(jnp.int32, (1, Np), 1)
        key_bias = jnp.where(col < N, 0.0, -1e30).astype(jnp.float32)    # (1, Np)
    else:
        key_bias = None

    def head_context(r0, c0):
        # q/k/v are reads from the VMEM scratch ref (no value-slice relayout copies).
        q = qkv_ref[pl.ds(r0, Np), c0:c0 + hd]              # scale folded into W_qkv
        k = qkv_ref[pl.ds(r0, Np), C + c0:C + c0 + hd]
        v = qkv_ref[pl.ds(r0, Np), 2 * C + c0:2 * C + c0 + hd]
        # q @ k^T without materializing a transpose (contract last dims of both).
        s = lax.dot_general(q, k, (((1,), (1,)), ((), ())),
                            preferred_element_type=jnp.float32)          # (Np, Np) f32
        if key_bias is not None:
            s = s + key_bias                                 # mask padded key columns
        s = s - jnp.max(s, axis=-1, keepdims=True)
        p = jnp.exp(s)
        denom = jnp.sum(p, axis=-1, keepdims=True)
        if approx_recip:
            p = p * pl.reciprocal(denom, approx=True)        # EUP slot
        else:
            p = p / denom
        return jnp.dot(p.astype(compute_dtype), v,
                       preferred_element_type=jnp.float32)   # (Np, hd) f32

    def process_batch_row(r0):
        # Heads in pairs: each ctx store is 2*hd lanes wide (lane-dense for hd >= 64).
        for pair in range(H // 2):
            c0 = 2 * pair * hd
            ctx = jnp.concatenate(
                [head_context(r0, c0), head_context(r0, c0 + hd)], axis=-1)
            ctx_ref[pl.ds(r0, Np), c0:c0 + 2 * hd] = ctx.astype(compute_dtype)
        if H % 2:                                            # odd head count remainder
            c0 = (H - 1) * hd
            ctx_ref[pl.ds(r0, Np), c0:c0 + hd] = (
                head_context(r0, c0).astype(compute_dtype))

    if Bt == 1:
        process_batch_row(0)                                 # fully static offsets
    else:
        @pl.loop(0, Bt)
        def _(bt):
            process_batch_row(pl.multiple_of(bt * Np, Np))   # sublane-aligned rows

    # ---- output projection: tall (Bt*Np, C) x (C, C) MXU matmul + bias in f32. ----
    y = jnp.dot(ctx_ref[...], wproj_ref[...], preferred_element_type=jnp.float32)
    o_ref[...] = (y + bproj_ref[...]).astype(o_ref.dtype)    # lane-dense final store


def _step_vmem_bytes(Bt, Np, C, in_bytes, out_bytes, cd_bytes):
    """Honest per-grid-step VMEM footprint estimate (bytes)."""
    rows = Bt * Np
    x_blk = 2 * rows * C * in_bytes                 # double-buffered input block
    o_blk = 2 * rows * C * out_bytes                # double-buffered output block
    weights = (3 * C * C + C * C) * cd_bytes + 4 * C        # single-buffered weights
    scratch = rows * 3 * C * cd_bytes + rows * C * cd_bytes  # qkv + ctx scratch
    transient = rows * 3 * C * 4 + rows * C * 4 + 4 * Np * Np * 4  # f32 live values
    return x_blk + o_blk + weights + scratch + transient


def _pick_batch_tile(B, Np, C, in_bytes, out_bytes, cd_bytes, budget):
    divisors = [d for d in range(1, B + 1) if B % d == 0]
    fits = [d for d in divisors
            if _step_vmem_bytes(d, Np, C, in_bytes, out_bytes, cd_bytes) <= budget]
    if not fits:
        return 1
    # Keep >= 2 grid steps when possible so v7x megacore can split the batch axis.
    multi = [d for d in fits if B // d >= 2]
    return max(multi) if multi else max(fits)


def _vmem_capacity_bytes():
    try:
        return int(pltpu.get_tpu_info().vmem_capacity_bytes)
    except Exception:
        return 128 << 20            # conservative v5e/v6e assumption


def mod_attention_pallas(x, w_qkv, w_proj, b_proj, *, num_heads,
                         qk_scale=None, compute_dtype=jnp.bfloat16,
                         batch_tile=None, vmem_limit_bytes=None,
                         approx_recip=True):
    B, N, C = x.shape
    assert C % num_heads == 0, "C must be divisible by num_heads"
    head_dim = C // num_heads
    scale = qk_scale if qk_scale is not None else head_dim ** (-0.5)
    compute_dtype = jnp.dtype(compute_dtype)
    out_dtype = x.dtype

    # Sublane-aligned token count; padded keys are masked inside the kernel.
    Np = ((N + 7) // 8) * 8
    # TODO(synk): for very long sequences consider padding Np to a multiple of 128 if
    # the non-128-multiple score-tile relayout shows up in profiles.

    # Fold softmax scale into the q-columns of W_qkv (removes per-head VPU mults).
    wq = w_qkv.astype(jnp.float32).at[:, :C].multiply(scale).astype(compute_dtype)
    wp = w_proj.astype(compute_dtype)
    bp = b_proj.reshape(1, C).astype(jnp.float32)   # bias added in f32 post-accumulate

    # Pad tokens, flatten to rows, cast activations (halves x HBM->VMEM traffic).
    xp = x if Np == N else jnp.pad(x, ((0, 0), (0, Np - N), (0, 0)))
    x2 = xp.reshape(B * Np, C).astype(compute_dtype)

    # Generation-aware tile sizing from physical VMEM.
    phys_vmem = _vmem_capacity_bytes()
    budget = (phys_vmem * 3) // 8     # ~24 MiB of v7x's 64 MiB, ~48 MiB of 128 MiB
    in_b = x2.dtype.itemsize
    out_b = jnp.dtype(out_dtype).itemsize
    cd_b = compute_dtype.itemsize
    Bt = batch_tile if batch_tile is not None else _pick_batch_tile(
        B, Np, C, in_b, out_b, cd_b, budget)
    assert B % Bt == 0, "batch_tile must divide B"
    if vmem_limit_bytes is None:
        est = _step_vmem_bytes(Bt, Np, C, in_b, out_b, cd_b)
        vmem_limit_bytes = int(min((phys_vmem * 3) // 4,
                                   max(32 << 20, int(est * 1.5))))

    kernel = functools.partial(
        _attention_kernel, num_heads=num_heads, batch_tile=Bt, padded_seq=Np,
        true_seq=N, compute_dtype=compute_dtype, approx_recip=approx_recip)

    def _const_spec(shape, buffered):
        if buffered:   # index_map never changes -> no point double-buffering
            return pl.BlockSpec(shape, lambda b: (0, 0), pipeline_mode=pl.Buffered(1))
        return pl.BlockSpec(shape, lambda b: (0, 0))

    def _run(buffered):
        return pl.pallas_call(
            kernel,
            out_shape=jax.ShapeDtypeStruct((B * Np, C), out_dtype),
            grid_spec=pltpu.PrefetchScalarGridSpec(
                num_scalar_prefetch=0,
                grid=(B // Bt,),
                in_specs=[
                    pl.BlockSpec((Bt * Np, C), lambda b: (b, 0)),   # x rows this step
                    _const_spec((C, 3 * C), buffered),              # W_qkv (resident)
                    _const_spec((C, C), buffered),                  # W_proj (resident)
                    _const_spec((1, C), buffered),                  # b_proj (resident)
                ],
                out_specs=pl.BlockSpec((Bt * Np, C), lambda b: (b, 0)),
                scratch_shapes=[
                    pltpu.VMEM((Bt * Np, 3 * C), compute_dtype),    # qkv scratch
                    pltpu.VMEM((Bt * Np, C), compute_dtype),        # ctx scratch
                ],
            ),
            compiler_params=pltpu.CompilerParams(
                dimension_semantics=("parallel",),
                vmem_limit_bytes=vmem_limit_bytes,
            ),
        )(x2, wq, wp, bp)

    try:
        out2 = _run(True)
    except Exception:   # pipeline_mode / pl.Buffered(1) unsupported in this jax build
        out2 = _run(False)

    out = out2.reshape(B, Np, C)
    return out[:, :N, :] if Np != N else out


def mod_attention_ref(x, w_qkv, w_proj, b_proj, *, num_heads):
    # Pure-JAX reference mirroring the PyTorch forward exactly.
    B, N, C = x.shape
    hd = C // num_heads
    scale = hd ** (-0.5)
    qkv = (x @ w_qkv).reshape(B, N, 3, num_heads, hd).transpose(2, 0, 3, 1, 4)
    q, k, v = qkv[0], qkv[1], qkv[2]                       # (B, H, N, hd)
    attn = jax.nn.softmax(jnp.einsum("bhnd,bhmd->bhnm", q, k) * scale, axis=-1)
    out = jnp.einsum("bhnm,bhmd->bhnd", attn, v)
    out = out.transpose(0, 2, 1, 3).reshape(B, N, C)
    return out @ w_proj + b_proj


if __name__ == "__main__":
    num_heads = 8
    B, N, C = 2, 13, 32       # N=13 exercises token padding + key masking (Np=16)

    key = jax.random.PRNGKey(0)
    kx, kqkv, kproj, kb = jax.random.split(key, 4)
    bound = 1.0 / math.sqrt(C)
    x = jax.random.normal(kx, (B, N, C), dtype=jnp.float32)
    w_qkv = jax.random.uniform(kqkv, (C, 3 * C), jnp.float32, -bound, bound)
    w_proj = jax.random.uniform(kproj, (C, C), jnp.float32, -bound, bound)
    b_proj = jax.random.uniform(kb, (C,), jnp.float32, -bound, bound)

    ref = mod_attention_ref(x, w_qkv, w_proj, b_proj, num_heads=num_heads)

    # Default fast path: bf16 MXU operands, f32 accumulation, approx softmax recip.
    out_bf16 = jax.block_until_ready(
        mod_attention_pallas(x, w_qkv, w_proj, b_proj, num_heads=num_heads))
    assert jnp.allclose(out_bf16.astype(jnp.float32), ref, atol=5e-2, rtol=5e-2), \
        "bf16 mismatch vs reference"

    # Exact path: f32 compute, exact reciprocal, multi-batch-row tile (Bt=2 in-kernel
    # loop path), no padding (N multiple of 8).
    B2, N2 = 2, 8
    x2 = jax.random.normal(kx, (B2, N2, C), dtype=jnp.float32)
    ref2 = mod_attention_ref(x2, w_qkv, w_proj, b_proj, num_heads=num_heads)
    out_f32 = jax.block_until_ready(
        mod_attention_pallas(x2, w_qkv, w_proj, b_proj, num_heads=num_heads,
                             compute_dtype=jnp.float32, batch_tile=B2,
                             approx_recip=False))
    assert jnp.allclose(out_f32, ref2, atol=1e-4, rtol=1e-4), "f32 mismatch vs reference"

    print("KERNEL_OK")
</pallas_src>

<mosaic_0001>
module attributes {stable_mosaic.version = 11 : i64} {
  func.func @_attention_kernel(%arg0: i32, %arg1: memref<16x32xbf16, #tpu.memory_space<vmem>>, %arg2: memref<32x96xbf16, #tpu.memory_space<vmem>>, %arg3: memref<32x32xbf16, #tpu.memory_space<vmem>>, %arg4: memref<1x32xf32, #tpu.memory_space<vmem>>, %arg5: memref<16x32xf32, #tpu.memory_space<vmem>>, %arg6: memref<16x96xbf16, #tpu.memory_space<vmem>>, %arg7: memref<16x32xbf16, #tpu.memory_space<vmem>>) attributes {dimension_semantics = [#tpu.dimension_semantics<parallel>], iteration_bounds = array<i64: 2>, scalar_prefetch = 0 : i64, scratch_operands = 2 : i64, tpu.core_type = #tpu.core_type<tc>, window_params = [{transform_indices = @transform_0, window_bounds = array<i64: 16, 32>}, {pipeline_mode = #tpu.pipeline_mode<synchronous>, transform_indices = @transform_1, window_bounds = array<i64: 32, 96>}, {pipeline_mode = #tpu.pipeline_mode<synchronous>, transform_indices = @transform_2, window_bounds = array<i64: 32, 32>}, {pipeline_mode = #tpu.pipeline_mode<synchronous>, transform_indices = @transform_3, window_bounds = array<i64: 1, 32>}, {transform_indices = @transform_4, window_bounds = array<i64: 16, 32>}]} {
    %c0 = arith.constant 0 : index
    %c0_0 = arith.constant 0 : index
    %0 = vector.load %arg1[%c0, %c0_0] : memref<16x32xbf16, #tpu.memory_space<vmem>>, vector<16x32xbf16>
    %c0_1 = arith.constant 0 : index
    %c0_2 = arith.constant 0 : index
    %1 = vector.load %arg2[%c0_1, %c0_2] : memref<32x96xbf16, #tpu.memory_space<vmem>>, vector<32x96xbf16>
    %cst = arith.constant dense<0.000000e+00> : vector<16x96xf32>
    %2 = tpu.matmul %0, %1, %cst {dimension_numbers = #tpu.dot_dimension_numbers<[1], [0], [0], [1], [0, 0, 1, 1], [], []>} : vector<16x32xbf16>, vector<32x96xbf16>, vector<16x96xf32> -> vector<16x96xf32>
    %3 = arith.truncf %2 : vector<16x96xf32> to vector<16x96xbf16>
    %c0_3 = arith.constant 0 : index
    %c0_4 = arith.constant 0 : index
    %4 = vector.load %arg6[%c0_3, %c0_4] : memref<16x96xbf16, #tpu.memory_space<vmem>>, vector<16x96xbf16>
    tpu.vector_store %arg6[%c0_3, %c0_4], %3 {strides = array<i32>} : memref<16x96xbf16, #tpu.memory_space<vmem>>, vector<16x96xbf16>,
    %5 = tpu.iota {dimensions = array<i32: 1>} : vector<1x16xi32>
    %c13_i32 = arith.constant 13 : i32
    %6 = vector.broadcast %c13_i32 : i32 to vector<1x16xi32>
    %7 = arith.cmpi slt, %5, %6 : vector<1x16xi32>
    %cst_5 = arith.constant 0.000000e+00 : f32
    %cst_6 = arith.constant -1.000000e+30 : f32
    %8 = vector.broadcast %cst_5 : f32 to vector<1x16xf32>
    %9 = vector.broadcast %cst_6 : f32 to vector<1x16xf32>
    %10 = arith.select %7, %8, %9 : vector<1x16xi1>, vector<1x16xf32>
    %c0_7 = arith.constant 0 : index
    %c0_8 = arith.constant 0 : index
    %11 = vector.load %arg6[%c0_7, %c0_8] : memref<16x96xbf16, #tpu.memory_space<vmem>>, vector<16x4xbf16>
    %c0_9 = arith.constant 0 : index
    %c32 = arith.constant 32 : index
    %12 = vector.load %arg6[%c0_9, %c32] : memref<16x96xbf16, #tpu.memory_space<vmem>>, vector<16x4xbf16>
    %c0_10 = arith.constant 0 : index
    %c64 = arith.constant 64 : index
    %13 = vector.load %arg6[%c0_10, %c64] : memref<16x96xbf16, #tpu.memory_space<vmem>>, vector<16x4xbf16>
    %cst_11 = arith.constant dense<0.000000e+00> : vector<16x16xf32>
    %14 = tpu.matmul %11, %12, %cst_11 {dimension_numbers = #tpu.dot_dimension_numbers<[1], [1], [0], [0], [0, 0, 1, 0], [], []>} : vector<16x4xbf16>, vector<16x4xbf16>, vector<16x16xf32> -> vector<16x16xf32>
    %15 = vector.broadcast %10 : vector<1x16xf32> to vector<16x16xf32>
    %16 = arith.addf %14, %15 : vector<16x16xf32>
    %cst_12 = arith.constant dense<0xFF800000> : vector<16xf32>
    %17 = vector.multi_reduction <maximumf>, %16, %cst_12 [1] : vector<16x16xf32> to vector<16xf32>
    %18 = vector.shape_cast %17 : vector<16xf32> to vector<16x1xf32>
    %19 = vector.broadcast %18 : vector<16x1xf32> to vector<16x16xf32>
    %20 = arith.subf %16, %19 : vector<16x16xf32>
    %21 = math.exp %20 : vector<16x16xf32>
    %cst_13 = arith.constant dense<0.000000e+00> : vector<16xf32>
    %22 = vector.multi_reduction <add>, %21, %cst_13 [1] : vector<16x16xf32> to vector<16xf32>
    %23 = vector.shape_cast %22 : vector<16xf32> to vector<16x1xf32>
    %24 = tpu.reciprocal %23 {approx = true} : vector<16x1xf32> -> vector<16x1xf32>
    %25 = vector.broadcast %24 : vector<16x1xf32> to vector<16x16xf32>
    %26 = arith.mulf %21, %25 : vector<16x16xf32>
    %27 = arith.truncf %26 : vector<16x16xf32> to vector<16x16xbf16>
    %cst_14 = arith.constant dense<0.000000e+00> : vector<16x4xf32>
    %28 = tpu.matmul %27, %13, %cst_14 {dimension_numbers = #tpu.dot_dimension_numbers<[1], [0], [0], [1], [0, 0, 1, 1], [], []>} : vector<16x16xbf16>, vector<16x4xbf16>, vector<16x4xf32> -> vector<16x4xf32>
    %c0_15 = arith.constant 0 : index
    %c4 = arith.constant 4 : index
    %29 = vector.load %arg6[%c0_15, %c4] : memref<16x96xbf16, #tpu.memory_space<vmem>>, vector<16x4xbf16>
    %c0_16 = arith.constant 0 : index
    %c36 = arith.constant 36 : index
    %30 = vector.load %arg6[%c0_16, %c36] : memref<16x96xbf16, #tpu.memory_space<vmem>>, vector<16x4xbf16>
    %c0_17 = arith.constant 0 : index
    %c68 = arith.constant 68 : index
    %31 = vector.load %arg6[%c0_17, %c68] : memref<16x96xbf16, #tpu.memory_space<vmem>>, vector<16x4xbf16>
    %cst_18 = arith.constant dense<0.000000e+00> : vector<16x16xf32>
    %32 = tpu.matmul %29, %30, %cst_18 {dimension_numbers = #tpu.dot_dimension_numbers<[1], [1], [0], [0], [0, 0, 1, 0], [], []>} : vector<16x4xbf16>, vector<16x4xbf16>, vector<16x16xf32> -> vector<16x16xf32>
    %33 = vector.broadcast %10 : vector<1x16xf32> to vector<16x16xf32>
    %34 = arith.addf %32, %33 : vector<16x16xf32>
    %cst_19 = arith.constant dense<0xFF800000> : vector<16xf32>
    %35 = vector.multi_reduction <maximumf>, %34, %cst_19 [1] : vector<16x16xf32> to vector<16xf32>
    %36 = vector.shape_cast %35 : vector<16xf32> to vector<16x1xf32>
    %37 = vector.broadcast %36 : vector<16x1xf32> to vector<16x16xf32>
    %38 = arith.subf %34, %37 : vector<16x16xf32>
    %39 = math.exp %38 : vector<16x16xf32>
    %cst_20 = arith.constant dense<0.000000e+00> : vector<16xf32>
    %40 = vector.multi_reduction <add>, %39, %cst_20 [1] : vector<16x16xf32> to vector<16xf32>
    %41 = vector.shape_cast %40 : vector<16xf32> to vector<16x1xf32>
    %42 = tpu.reciprocal %41 {approx = true} : vector<16x1xf32> -> vector<16x1xf32>
    %43 = vector.broadcast %42 : vector<16x1xf32> to vector<16x16xf32>
    %44 = arith.mulf %39, %43 : vector<16x16xf32>
    %45 = arith.truncf %44 : vector<16x16xf32> to vector<16x16xbf16>
    %cst_21 = arith.constant dense<0.000000e+00> : vector<16x4xf32>
    %46 = tpu.matmul %45, %31, %cst_21 {dimension_numbers = #tpu.dot_dimension_numbers<[1], [0], [0], [1], [0, 0, 1, 1], [], []>} : vector<16x16xbf16>, vector<16x4xbf16>, vector<16x4xf32> -> vector<16x4xf32>
    %47 = tpu.concatenate %28, %46 in 1 : vector<16x4xf32>, vector<16x4xf32> -> vector<16x8xf32>
    %48 = arith.truncf %47 : vector<16x8xf32> to vector<16x8xbf16>
    %c0_22 = arith.constant 0 : index
    %c0_23 = arith.constant 0 : index
    %49 = vector.load %arg7[%c0_22, %c0_23] : memref<16x32xbf16, #tpu.memory_space<vmem>>, vector<16x8xbf16>
    tpu.vector_store %arg7[%c0_22, %c0_23], %48 {strides = array<i32>} : memref<16x32xbf16, #tpu.memory_space<vmem>>, vector<16x8xbf16>,
    %c0_24 = arith.constant 0 : index
    %c8 = arith.constant 8 : index
    %50 = vector.load %arg6[%c0_24, %c8] : memref<16x96xbf16, #tpu.memory_space<vmem>>, vector<16x4xbf16>
    %c0_25 = arith.constant 0 : index
    %c40 = arith.constant 40 : index
    %51 = vector.load %arg6[%c0_25, %c40] : memref<16x96xbf16, #tpu.memory_space<vmem>>, vector<16x4xbf16>
    %c0_26 = arith.constant 0 : index
    %c72 = arith.constant 72 : index
    %52 = vector.load %arg6[%c0_26, %c72] : memref<16x96xbf16, #tpu.memory_space<vmem>>, vector<16x4xbf16>
    %cst_27 = arith.constant dense<0.000000e+00> : vector<16x16xf32>
    %53 = tpu.matmul %50, %51, %cst_27 {dimension_numbers = #tpu.dot_dimension_numbers<[1], [1], [0], [0], [0, 0, 1, 0], [], []>} : vector<16x4xbf16>, vector<16x4xbf16>, vector<16x16xf32> -> vector<16x16xf32>
    %54 = vector.broadcast %10 : vector<1x16xf32> to vector<16x16xf32>
    %55 = arith.addf %53, %54 : vector<16x16xf32>
    %cst_28 = arith.constant dense<0xFF800000> : vector<16xf32>
    %56 = vector.multi_reduction <maximumf>, %55, %cst_28 [1] : vector<16x16xf32> to vector<16xf32>
    %57 = vector.shape_cast %56 : vector<16xf32> to vector<16x1xf32>
    %58 = vector.broadcast %57 : vector<16x1xf32> to vector<16x16xf32>
    %59 = arith.subf %55, %58 : vector<16x16xf32>
    %60 = math.exp %59 : vector<16x16xf32>
    %cst_29 = arith.constant dense<0.000000e+00> : vector<16xf32>
    %61 = vector.multi_reduction <add>, %60, %cst_29 [1] : vector<16x16xf32> to vector<16xf32>
    %62 = vector.shape_cast %61 : vector<16xf32> to vector<16x1xf32>
    %63 = tpu.reciprocal %62 {approx = true} : vector<16x1xf32> -> vector<16x1xf32>
    %64 = vector.broadcast %63 : vector<16x1xf32> to vector<16x16xf32>
    %65 = arith.mulf %60, %64 : vector<16x16xf32>
    %66 = arith.truncf %65 : vector<16x16xf32> to vector<16x16xbf16>
    %cst_30 = arith.constant dense<0.000000e+00> : vector<16x4xf32>
    %67 = tpu.matmul %66, %52, %cst_30 {dimension_numbers = #tpu.dot_dimension_numbers<[1], [0], [0], [1], [0, 0, 1, 1], [], []>} : vector<16x16xbf16>, vector<16x4xbf16>, vector<16x4xf32> -> vector<16x4xf32>
    %c0_31 = arith.constant 0 : index
    %c12 = arith.constant 12 : index
    %68 = vector.load %arg6[%c0_31, %c12] : memref<16x96xbf16, #tpu.memory_space<vmem>>, vector<16x4xbf16>
    %c0_32 = arith.constant 0 : index
    %c44 = arith.constant 44 : index
    %69 = vector.load %arg6[%c0_32, %c44] : memref<16x96xbf16, #tpu.memory_space<vmem>>, vector<16x4xbf16>
    %c0_33 = arith.constant 0 : index
    %c76 = arith.constant 76 : index
    %70 = vector.load %arg6[%c0_33, %c76] : memref<16x96xbf16, #tpu.memory_space<vmem>>, vector<16x4xbf16>
    %cst_34 = arith.constant dense<0.000000e+00> : vector<16x16xf32>
    %71 = tpu.matmul %68, %69, %cst_34 {dimension_numbers = #tpu.dot_dimension_numbers<[1], [1], [0], [0], [0, 0, 1, 0], [], []>} : vector<16x4xbf16>, vector<16x4xbf16>, vector<16x16xf32> -> vector<16x16xf32>
    %72 = vector.broadcast %10 : vector<1x16xf32> to vector<16x16xf32>
    %73 = arith.addf %71, %72 : vector<16x16xf32>
    %cst_35 = arith.constant dense<0xFF800000> : vector<16xf32>
    %74 = vector.multi_reduction <maximumf>, %73, %cst_35 [1] : vector<16x16xf32> to vector<16xf32>
    %75 = vector.shape_cast %74 : vector<16xf32> to vector<16x1xf32>
    %76 = vector.broadcast %75 : vector<16x1xf32> to vector<16x16xf32>
    %77 = arith.subf %73, %76 : vector<16x16xf32>
    %78 = math.exp %77 : vector<16x16xf32>
    %cst_36 = arith.constant dense<0.000000e+00> : vector<16xf32>
    %79 = vector.multi_reduction <add>, %78, %cst_36 [1] : vector<16x16xf32> to vector<16xf32>
    %80 = vector.shape_cast %79 : vector<16xf32> to vector<16x1xf32>
    %81 = tpu.reciprocal %80 {approx = true} : vector<16x1xf32> -> vector<16x1xf32>
    %82 = vector.broadcast %81 : vector<16x1xf32> to vector<16x16xf32>
    %83 = arith.mulf %78, %82 : vector<16x16xf32>
    %84 = arith.truncf %83 : vector<16x16xf32> to vector<16x16xbf16>
    %cst_37 = arith.constant dense<0.000000e+00> : vector<16x4xf32>
    %85 = tpu.matmul %84, %70, %cst_37 {dimension_numbers = #tpu.dot_dimension_numbers<[1], [0], [0], [1], [0, 0, 1, 1], [], []>} : vector<16x16xbf16>, vector<16x4xbf16>, vector<16x4xf32> -> vector<16x4xf32>
    %86 = tpu.concatenate %67, %85 in 1 : vector<16x4xf32>, vector<16x4xf32> -> vector<16x8xf32>
    %87 = arith.truncf %86 : vector<16x8xf32> to vector<16x8xbf16>
    %c0_38 = arith.constant 0 : index
    %c8_39 = arith.constant 8 : index
    %88 = vector.load %arg7[%c0_38, %c8_39] : memref<16x32xbf16, #tpu.memory_space<vmem>>, vector<16x8xbf16>
    tpu.vector_store %arg7[%c0_38, %c8_39], %87 {strides = array<i32>} : memref<16x32xbf16, #tpu.memory_space<vmem>>, vector<16x8xbf16>,
    %c0_40 = arith.constant 0 : index
    %c16 = arith.constant 16 : index
    %89 = vector.load %arg6[%c0_40, %c16] : memref<16x96xbf16, #tpu.memory_space<vmem>>, vector<16x4xbf16>
    %c0_41 = arith.constant 0 : index
    %c48 = arith.constant 48 : index
    %90 = vector.load %arg6[%c0_41, %c48] : memref<16x96xbf16, #tpu.memory_space<vmem>>, vector<16x4xbf16>
    %c0_42 = arith.constant 0 : index
    %c80 = arith.constant 80 : index
    %91 = vector.load %arg6[%c0_42, %c80] : memref<16x96xbf16, #tpu.memory_space<vmem>>, vector<16x4xbf16>
    %cst_43 = arith.constant dense<0.000000e+00> : vector<16x16xf32>
    %92 = tpu.matmul %89, %90, %cst_43 {dimension_numbers = #tpu.dot_dimension_numbers<[1], [1], [0], [0], [0, 0, 1, 0], [], []>} : vector<16x4xbf16>, vector<16x4xbf16>, vector<16x16xf32> -> vector<16x16xf32>
    %93 = vector.broadcast %10 : vector<1x16xf32> to vector<16x16xf32>
    %94 = arith.addf %92, %93 : vector<16x16xf32>
    %cst_44 = arith.constant dense<0xFF800000> : vector<16xf32>
    %95 = vector.multi_reduction <maximumf>, %94, %cst_44 [1] : vector<16x16xf32> to vector<16xf32>
    %96 = vector.shape_cast %95 : vector<16xf32> to vector<16x1xf32>
    %97 = vector.broadcast %96 : vector<16x1xf32> to vector<16x16xf32>
    %98 = arith.subf %94, %97 : vector<16x16xf32>
    %99 = math.exp %98 : vector<16x16xf32>
    %cst_45 = arith.constant dense<0.000000e+00> : vector<16xf32>
    %100 = vector.multi_reduction <add>, %99, %cst_45 [1] : vector<16x16xf32> to vector<16xf32>
    %101 = vector.shape_cast %100 : vector<16xf32> to vector<16x1xf32>
    %102 = tpu.reciprocal %101 {approx = true} : vector<16x1xf32> -> vector<16x1xf32>
    %103 = vector.broadcast %102 : vector<16x1xf32> to vector<16x16xf32>
    %104 = arith.mulf %99, %103 : vector<16x16xf32>
    %105 = arith.truncf %104 : vector<16x16xf32> to vector<16x16xbf16>
    %cst_46 = arith.constant dense<0.000000e+00> : vector<16x4xf32>
    %106 = tpu.matmul %105, %91, %cst_46 {dimension_numbers = #tpu.dot_dimension_numbers<[1], [0], [0], [1], [0, 0, 1, 1], [], []>} : vector<16x16xbf16>, vector<16x4xbf16>, vector<16x4xf32> -> vector<16x4xf32>
    %c0_47 = arith.constant 0 : index
    %c20 = arith.constant 20 : index
    %107 = vector.load %arg6[%c0_47, %c20] : memref<16x96xbf16, #tpu.memory_space<vmem>>, vector<16x4xbf16>
    %c0_48 = arith.constant 0 : index
    %c52 = arith.constant 52 : index
    %108 = vector.load %arg6[%c0_48, %c52] : memref<16x96xbf16, #tpu.memory_space<vmem>>, vector<16x4xbf16>
    %c0_49 = arith.constant 0 : index
    %c84 = arith.constant 84 : index
    %109 = vector.load %arg6[%c0_49, %c84] : memref<16x96xbf16, #tpu.memory_space<vmem>>, vector<16x4xbf16>
    %cst_50 = arith.constant dense<0.000000e+00> : vector<16x16xf32>
    %110 = tpu.matmul %107, %108, %cst_50 {dimension_numbers = #tpu.dot_dimension_numbers<[1], [1], [0], [0], [0, 0, 1, 0], [], []>} : vector<16x4xbf16>, vector<16x4xbf16>, vector<16x16xf32> -> vector<16x16xf32>
    %111 = vector.broadcast %10 : vector<1x16xf32> to vector<16x16xf32>
    %112 = arith.addf %110, %111 : vector<16x16xf32>
    %cst_51 = arith.constant dense<0xFF800000> : vector<16xf32>
    %113 = vector.multi_reduction <maximumf>, %112, %cst_51 [1] : vector<16x16xf32> to vector<16xf32>
    %114 = vector.shape_cast %113 : vector<16xf32> to vector<16x1xf32>
    %115 = vector.broadcast %114 : vector<16x1xf32> to vector<16x16xf32>
    %116 = arith.subf %112, %115 : vector<16x16xf32>
    %117 = math.exp %116 : vector<16x16xf32>
    %cst_52 = arith.constant dense<0.000000e+00> : vector<16xf32>
    %118 = vector.multi_reduction <add>, %117, %cst_52 [1] : vector<16x16xf32> to vector<16xf32>
    %119 = vector.shape_cast %118 : vector<16xf32> to vector<16x1xf32>
    %120 = tpu.reciprocal %119 {approx = true} : vector<16x1xf32> -> vector<16x1xf32>
    %121 = vector.broadcast %120 : vector<16x1xf32> to vector<16x16xf32>
    %122 = arith.mulf %117, %121 : vector<16x16xf32>
    %123 = arith.truncf %122 : vector<16x16xf32> to vector<16x16xbf16>
    %cst_53 = arith.constant dense<0.000000e+00> : vector<16x4xf32>
    %124 = tpu.matmul %123, %109, %cst_53 {dimension_numbers = #tpu.dot_dimension_numbers<[1], [0], [0], [1], [0, 0, 1, 1], [], []>} : vector<16x16xbf16>, vector<16x4xbf16>, vector<16x4xf32> -> vector<16x4xf32>
    %125 = tpu.concatenate %106, %124 in 1 : vector<16x4xf32>, vector<16x4xf32> -> vector<16x8xf32>
    %126 = arith.truncf %125 : vector<16x8xf32> to vector<16x8xbf16>
    %c0_54 = arith.constant 0 : index
    %c16_55 = arith.constant 16 : index
    %127 = vector.load %arg7[%c0_54, %c16_55] : memref<16x32xbf16, #tpu.memory_space<vmem>>, vector<16x8xbf16>
    tpu.vector_store %arg7[%c0_54, %c16_55], %126 {strides = array<i32>} : memref<16x32xbf16, #tpu.memory_space<vmem>>, vector<16x8xbf16>,
    %c0_56 = arith.constant 0 : index
    %c24 = arith.constant 24 : index
    %128 = vector.load %arg6[%c0_56, %c24] : memref<16x96xbf16, #tpu.memory_space<vmem>>, vector<16x4xbf16>
    %c0_57 = arith.constant 0 : index
    %c56 = arith.constant 56 : index
    %129 = vector.load %arg6[%c0_57, %c56] : memref<16x96xbf16, #tpu.memory_space<vmem>>, vector<16x4xbf16>
    %c0_58 = arith.constant 0 : index
    %c88 = arith.constant 88 : index
    %130 = vector.load %arg6[%c0_58, %c88] : memref<16x96xbf16, #tpu.memory_space<vmem>>, vector<16x4xbf16>
    %cst_59 = arith.constant dense<0.000000e+00> : vector<16x16xf32>
    %131 = tpu.matmul %128, %129, %cst_59 {dimension_numbers = #tpu.dot_dimension_numbers<[1], [1], [0], [0], [0, 0, 1, 0], [], []>} : vector<16x4xbf16>, vector<16x4xbf16>, vector<16x16xf32> -> vector<16x16xf32>
    %132 = vector.broadcast %10 : vector<1x16xf32> to vector<16x16xf32>
    %133 = arith.addf %131, %132 : vector<16x16xf32>
    %cst_60 = arith.constant dense<0xFF800000> : vector<16xf32>
    %134 = vector.multi_reduction <maximumf>, %133, %cst_60 [1] : vector<16x16xf32> to vector<16xf32>
    %135 = vector.shape_cast %134 : vector<16xf32> to vector<16x1xf32>
    %136 = vector.broadcast %135 : vector<16x1xf32> to vector<16x16xf32>
    %137 = arith.subf %133, %136 : vector<16x16xf32>
    %138 = math.exp %137 : vector<16x16xf32>
    %cst_61 = arith.constant dense<0.000000e+00> : vector<16xf32>
    %139 = vector.multi_reduction <add>, %138, %cst_61 [1] : vector<16x16xf32> to vector<16xf32>
    %140 = vector.shape_cast %139 : vector<16xf32> to vector<16x1xf32>
    %141 = tpu.reciprocal %140 {approx = true} : vector<16x1xf32> -> vector<16x1xf32>
    %142 = vector.broadcast %141 : vector<16x1xf32> to vector<16x16xf32>
    %143 = arith.mulf %138, %142 : vector<16x16xf32>
    %144 = arith.truncf %143 : vector<16x16xf32> to vector<16x16xbf16>
    %cst_62 = arith.constant dense<0.000000e+00> : vector<16x4xf32>
    %145 = tpu.matmul %144, %130, %cst_62 {dimension_numbers = #tpu.dot_dimension_numbers<[1], [0], [0], [1], [0, 0, 1, 1], [], []>} : vector<16x16xbf16>, vector<16x4xbf16>, vector<16x4xf32> -> vector<16x4xf32>
    %c0_63 = arith.constant 0 : index
    %c28 = arith.constant 28 : index
    %146 = vector.load %arg6[%c0_63, %c28] : memref<16x96xbf16, #tpu.memory_space<vmem>>, vector<16x4xbf16>
    %c0_64 = arith.constant 0 : index
    %c60 = arith.constant 60 : index
    %147 = vector.load %arg6[%c0_64, %c60] : memref<16x96xbf16, #tpu.memory_space<vmem>>, vector<16x4xbf16>
    %c0_65 = arith.constant 0 : index
    %c92 = arith.constant 92 : index
    %148 = vector.load %arg6[%c0_65, %c92] : memref<16x96xbf16, #tpu.memory_space<vmem>>, vector<16x4xbf16>
    %cst_66 = arith.constant dense<0.000000e+00> : vector<16x16xf32>
    %149 = tpu.matmul %146, %147, %cst_66 {dimension_numbers = #tpu.dot_dimension_numbers<[1], [1], [0], [0], [0, 0, 1, 0], [], []>} : vector<16x4xbf16>, vector<16x4xbf16>, vector<16x16xf32> -> vector<16x16xf32>
    %150 = vector.broadcast %10 : vector<1x16xf32> to vector<16x16xf32>
    %151 = arith.addf %149, %150 : vector<16x16xf32>
    %cst_67 = arith.constant dense<0xFF800000> : vector<16xf32>
    %152 = vector.multi_reduction <maximumf>, %151, %cst_67 [1] : vector<16x16xf32> to vector<16xf32>
    %153 = vector.shape_cast %152 : vector<16xf32> to vector<16x1xf32>
    %154 = vector.broadcast %153 : vector<16x1xf32> to vector<16x16xf32>
    %155 = arith.subf %151, %154 : vector<16x16xf32>
    %156 = math.exp %155 : vector<16x16xf32>
    %cst_68 = arith.constant dense<0.000000e+00> : vector<16xf32>
    %157 = vector.multi_reduction <add>, %156, %cst_68 [1] : vector<16x16xf32> to vector<16xf32>
    %158 = vector.shape_cast %157 : vector<16xf32> to vector<16x1xf32>
    %159 = tpu.reciprocal %158 {approx = true} : vector<16x1xf32> -> vector<16x1xf32>
    %160 = vector.broadcast %159 : vector<16x1xf32> to vector<16x16xf32>
    %161 = arith.mulf %156, %160 : vector<16x16xf32>
    %162 = arith.truncf %161 : vector<16x16xf32> to vector<16x16xbf16>
    %cst_69 = arith.constant dense<0.000000e+00> : vector<16x4xf32>
    %163 = tpu.matmul %162, %148, %cst_69 {dimension_numbers = #tpu.dot_dimension_numbers<[1], [0], [0], [1], [0, 0, 1, 1], [], []>} : vector<16x16xbf16>, vector<16x4xbf16>, vector<16x4xf32> -> vector<16x4xf32>
    %164 = tpu.concatenate %145, %163 in 1 : vector<16x4xf32>, vector<16x4xf32> -> vector<16x8xf32>
    %165 = arith.truncf %164 : vector<16x8xf32> to vector<16x8xbf16>
    %c0_70 = arith.constant 0 : index
    %c24_71 = arith.constant 24 : index
    %166 = vector.load %arg7[%c0_70, %c24_71] : memref<16x32xbf16, #tpu.memory_space<vmem>>, vector<16x8xbf16>
    tpu.vector_store %arg7[%c0_70, %c24_71], %165 {strides = array<i32>} : memref<16x32xbf16, #tpu.memory_space<vmem>>, vector<16x8xbf16>,
    %c0_72 = arith.constant 0 : index
    %c0_73 = arith.constant 0 : index
    %167 = vector.load %arg7[%c0_72, %c0_73] : memref<16x32xbf16, #tpu.memory_space<vmem>>, vector<16x32xbf16>
    %c0_74 = arith.constant 0 : index
    %c0_75 = arith.constant 0 : index
    %168 = vector.load %arg3[%c0_74, %c0_75] : memref<32x32xbf16, #tpu.memory_space<vmem>>, vector<32x32xbf16>
    %cst_76 = arith.constant dense<0.000000e+00> : vector<16x32xf32>
    %169 = tpu.matmul %167, %168, %cst_76 {dimension_numbers = #tpu.dot_dimension_numbers<[1], [0], [0], [1], [0, 0, 1, 1], [], []>} : vector<16x32xbf16>, vector<32x32xbf16>, vector<16x32xf32> -> vector<16x32xf32>
    %c0_77 = arith.constant 0 : index
    %c0_78 = arith.constant 0 : index
    %170 = vector.load %arg4[%c0_77, %c0_78] : memref<1x32xf32, #tpu.memory_space<vmem>>, vector<1x32xf32>
    %171 = vector.broadcast %170 : vector<1x32xf32> to vector<16x32xf32>
    %172 = arith.addf %169, %171 : vector<16x32xf32>
    %c0_79 = arith.constant 0 : index
    %c0_80 = arith.constant 0 : index
    %173 = vector.load %arg5[%c0_79, %c0_80] : memref<16x32xf32, #tpu.memory_space<vmem>>, vector<16x32xf32>
    tpu.vector_store %arg5[%c0_79, %c0_80], %172 {strides = array<i32>} : memref<16x32xf32, #tpu.memory_space<vmem>>, vector<16x32xf32>,
    return
  }
  func.func @transform_0(%arg0: i32) -> (i32, i32) {
    %c0_i32 = arith.constant 0 : i32
    %c0_i32_0 = arith.constant 0 : i32
    return %arg0, %c0_i32 : i32, i32
  }
  func.func @transform_1(%arg0: i32) -> (i32, i32) {
    %c0_i32 = arith.constant 0 : i32
    %c0_i32_0 = arith.constant 0 : i32
    %c0_i32_1 = arith.constant 0 : i32
    return %c0_i32, %c0_i32_0 : i32, i32
  }
  func.func @transform_2(%arg0: i32) -> (i32, i32) {
    %c0_i32 = arith.constant 0 : i32
    %c0_i32_0 = arith.constant 0 : i32
    %c0_i32_1 = arith.constant 0 : i32
    return %c0_i32, %c0_i32_0 : i32, i32
  }
  func.func @transform_3(%arg0: i32) -> (i32, i32) {
    %c0_i32 = arith.constant 0 : i32
    %c0_i32_0 = arith.constant 0 : i32
    %c0_i32_1 = arith.constant 0 : i32
    return %c0_i32, %c0_i32_0 : i32, i32
  }
  func.func @transform_4(%arg0: i32) -> (i32, i32) {
    %c0_i32 = arith.constant 0 : i32
    %c0_i32_0 = arith.constant 0 : i32
    return %arg0, %c0_i32 : i32, i32
  }
}

module attributes {stable_mosaic.version = 11 : i64} {
  func.func @_attention_kernel(%arg0: i32, %arg1: memref<16x32xbf16, #tpu.memory_space<vmem>>, %arg2: memref<32x96xbf16, #tpu.memory_space<vmem>>, %arg3: memref<32x32xbf16, #tpu.memory_space<vmem>>, %arg4: memref<1x32xf32, #tpu.memory_space<vmem>>, %arg5: memref<16x32xf32, #tpu.memory_space<vmem>>, %arg6: memref<16x96xbf16, #tpu.memory_space<vmem>>, %arg7: memref<16x32xbf16, #tpu.memory_space<vmem>>) attributes {dimension_semantics = [#tpu.dimension_semantics<parallel>], iteration_bounds = array<i64: 2>, scalar_prefetch = 0 : i64, scratch_operands = 2 : i64, tpu.core_type = #tpu.core_type<tc>, window_params = [{transform_indices = @transform_0, window_bounds = array<i64: 16, 32>}, {pipeline_mode = #tpu.pipeline_mode<synchronous>, transform_indices = @transform_1, window_bounds = array<i64: 32, 96>}, {pipeline_mode = #tpu.pipeline_mode<synchronous>, transform_indices = @transform_2, window_bounds = array<i64: 32, 32>}, {pipeline_mode = #tpu.pipeline_mode<synchronous>, transform_indices = @transform_3, window_bounds = array<i64: 1, 32>}, {transform_indices = @transform_4, window_bounds = array<i64: 16, 32>}]} {
    %c0 = arith.constant 0 : index
    %c0_0 = arith.constant 0 : index
    %0 = vector.load %arg1[%c0, %c0_0] : memref<16x32xbf16, #tpu.memory_space<vmem>>, vector<16x32xbf16>
    %c0_1 = arith.constant 0 : index
    %c0_2 = arith.constant 0 : index
    %1 = vector.load %arg2[%c0_1, %c0_2] : memref<32x96xbf16, #tpu.memory_space<vmem>>, vector<32x96xbf16>
    %cst = arith.constant dense<0.000000e+00> : vector<16x96xf32>
    %2 = tpu.matmul %0, %1, %cst {dimension_numbers = #tpu.dot_dimension_numbers<[1], [0], [0], [1], [0, 0, 1, 1], [], []>} : vector<16x32xbf16>, vector<32x96xbf16>, vector<16x96xf32> -> vector<16x96xf32>
    %3 = arith.truncf %2 : vector<16x96xf32> to vector<16x96xbf16>
    %c0_3 = arith.constant 0 : index
    %c0_4 = arith.constant 0 : index
    %4 = vector.load %arg6[%c0_3, %c0_4] : memref<16x96xbf16, #tpu.memory_space<vmem>>, vector<16x96xbf16>
    tpu.vector_store %arg6[%c0_3, %c0_4], %3 {strides = array<i32>} : memref<16x96xbf16, #tpu.memory_space<vmem>>, vector<16x96xbf16>,
    %5 = tpu.iota {dimensions = array<i32: 1>} : vector<1x16xi32>
    %c13_i32 = arith.constant 13 : i32
    %6 = vector.broadcast %c13_i32 : i32 to vector<1x16xi32>
    %7 = arith.cmpi slt, %5, %6 : vector<1x16xi32>
    %cst_5 = arith.constant 0.000000e+00 : f32
    %cst_6 = arith.constant -1.000000e+30 : f32
    %8 = vector.broadcast %cst_5 : f32 to vector<1x16xf32>
    %9 = vector.broadcast %cst_6 : f32 to vector<1x16xf32>
    %10 = arith.select %7, %8, %9 : vector<1x16xi1>, vector<1x16xf32>
    %c0_7 = arith.constant 0 : index
    %c0_8 = arith.constant 0 : index
    %11 = vector.load %arg6[%c0_7, %c0_8] : memref<16x96xbf16, #tpu.memory_space<vmem>>, vector<16x4xbf16>
    %c0_9 = arith.constant 0 : index
    %c32 = arith.constant 32 : index
    %12 = vector.load %arg6[%c0_9, %c32] : memref<16x96xbf16, #tpu.memory_space<vmem>>, vector<16x4xbf16>
    %c0_10 = arith.constant 0 : index
    %c64 = arith.constant 64 : index
    %13 = vector.load %arg6[%c0_10, %c64] : memref<16x96xbf16, #tpu.memory_space<vmem>>, vector<16x4xbf16>
    %cst_11 = arith.constant dense<0.000000e+00> : vector<16x16xf32>
    %14 = tpu.matmul %11, %12, %cst_11 {dimension_numbers = #tpu.dot_dimension_numbers<[1], [1], [0], [0], [0, 0, 1, 0], [], []>} : vector<16x4xbf16>, vector<16x4xbf16>, vector<16x16xf32> -> vector<16x16xf32>
    %15 = vector.broadcast %10 : vector<1x16xf32> to vector<16x16xf32>
    %16 = arith.addf %14, %15 : vector<16x16xf32>
    %cst_12 = arith.constant dense<0xFF800000> : vector<16xf32>
    %17 = vector.multi_reduction <maximumf>, %16, %cst_12 [1] : vector<16x16xf32> to vector<16xf32>
    %18 = vector.shape_cast %17 : vector<16xf32> to vector<16x1xf32>
    %19 = vector.broadcast %18 : vector<16x1xf32> to vector<16x16xf32>
    %20 = arith.subf %16, %19 : vector<16x16xf32>
    %21 = math.exp %20 : vector<16x16xf32>
    %cst_13 = arith.constant dense<0.000000e+00> : vector<16xf32>
    %22 = vector.multi_reduction <add>, %21, %cst_13 [1] : vector<16x16xf32> to vector<16xf32>
    %23 = vector.shape_cast %22 : vector<16xf32> to vector<16x1xf32>
    %24 = tpu.reciprocal %23 {approx = true} : vector<16x1xf32> -> vector<16x1xf32>
    %25 = vector.broadcast %24 : vector<16x1xf32> to vector<16x16xf32>
    %26 = arith.mulf %21, %25 : vector<16x16xf32>
    %27 = arith.truncf %26 : vector<16x16xf32> to vector<16x16xbf16>
    %cst_14 = arith.constant dense<0.000000e+00> : vector<16x4xf32>
    %28 = tpu.matmul %27, %13, %cst_14 {dimension_numbers = #tpu.dot_dimension_numbers<[1], [0], [0], [1], [0, 0, 1, 1], [], []>} : vector<16x16xbf16>, vector<16x4xbf16>, vector<16x4xf32> -> vector<16x4xf32>
    %c0_15 = arith.constant 0 : index
    %c4 = arith.constant 4 : index
    %29 = vector.load %arg6[%c0_15, %c4] : memref<16x96xbf16, #tpu.memory_space<vmem>>, vector<16x4xbf16>
    %c0_16 = arith.constant 0 : index
    %c36 = arith.constant 36 : index
    %30 = vector.load %arg6[%c0_16, %c36] : memref<16x96xbf16, #tpu.memory_space<vmem>>, vector<16x4xbf16>
    %c0_17 = arith.constant 0 : index
    %c68 = arith.constant 68 : index
    %31 = vector.load %arg6[%c0_17, %c68] : memref<16x96xbf16, #tpu.memory_space<vmem>>, vector<16x4xbf16>
    %cst_18 = arith.constant dense<0.000000e+00> : vector<16x16xf32>
    %32 = tpu.matmul %29, %30, %cst_18 {dimension_numbers = #tpu.dot_dimension_numbers<[1], [1], [0], [0], [0, 0, 1, 0], [], []>} : vector<16x4xbf16>, vector<16x4xbf16>, vector<16x16xf32> -> vector<16x16xf32>
    %33 = vector.broadcast %10 : vector<1x16xf32> to vector<16x16xf32>
    %34 = arith.addf %32, %33 : vector<16x16xf32>
    %cst_19 = arith.constant dense<0xFF800000> : vector<16xf32>
    %35 = vector.multi_reduction <maximumf>, %34, %cst_19 [1] : vector<16x16xf32> to vector<16xf32>
    %36 = vector.shape_cast %35 : vector<16xf32> to vector<16x1xf32>
    %37 = vector.broadcast %36 : vector<16x1xf32> to vector<16x16xf32>
    %38 = arith.subf %34, %37 : vector<16x16xf32>
    %39 = math.exp %38 : vector<16x16xf32>
    %cst_20 = arith.constant dense<0.000000e+00> : vector<16xf32>
    %40 = vector.multi_reduction <add>, %39, %cst_20 [1] : vector<16x16xf32> to vector<16xf32>
    %41 = vector.shape_cast %40 : vector<16xf32> to vector<16x1xf32>
    %42 = tpu.reciprocal %41 {approx = true} : vector<16x1xf32> -> vector<16x1xf32>
    %43 = vector.broadcast %42 : vector<16x1xf32> to vector<16x16xf32>
    %44 = arith.mulf %39, %43 : vector<16x16xf32>
    %45 = arith.truncf %44 : vector<16x16xf32> to vector<16x16xbf16>
    %cst_21 = arith.constant dense<0.000000e+00> : vector<16x4xf32>
    %46 = tpu.matmul %45, %31, %cst_21 {dimension_numbers = #tpu.dot_dimension_numbers<[1], [0], [0], [1], [0, 0, 1, 1], [], []>} : vector<16x16xbf16>, vector<16x4xbf16>, vector<16x4xf32> -> vector<16x4xf32>
    %47 = tpu.concatenate %28, %46 in 1 : vector<16x4xf32>, vector<16x4xf32> -> vector<16x8xf32>
    %48 = arith.truncf %47 : vector<16x8xf32> to vector<16x8xbf16>
    %c0_22 = arith.constant 0 : index
    %c0_23 = arith.constant 0 : index
    %49 = vector.load %arg7[%c0_22, %c0_23] : memref<16x32xbf16, #tpu.memory_space<vmem>>, vector<16x8xbf16>
    tpu.vector_store %arg7[%c0_22, %c0_23], %48 {strides = array<i32>} : memref<16x32xbf16, #tpu.memory_space<vmem>>, vector<16x8xbf16>,
    %c0_24 = arith.constant 0 : index
    %c8 = arith.constant 8 : index
    %50 = vector.load %arg6[%c0_24, %c8] : memref<16x96xbf16, #tpu.memory_space<vmem>>, vector<16x4xbf16>
    %c0_25 = arith.constant 0 : index
    %c40 = arith.constant 40 : index
    %51 = vector.load %arg6[%c0_25, %c40] : memref<16x96xbf16, #tpu.memory_space<vmem>>, vector<16x4xbf16>
    %c0_26 = arith.constant 0 : index
    %c72 = arith.constant 72 : index
    %52 = vector.load %arg6[%c0_26, %c72] : memref<16x96xbf16, #tpu.memory_space<vmem>>, vector<16x4xbf16>
    %cst_27 = arith.constant dense<0.000000e+00> : vector<16x16xf32>
    %53 = tpu.matmul %50, %51, %cst_27 {dimension_numbers = #tpu.dot_dimension_numbers<[1], [1], [0], [0], [0, 0, 1, 0], [], []>} : vector<16x4xbf16>, vector<16x4xbf16>, vector<16x16xf32> -> vector<16x16xf32>
    %54 = vector.broadcast %10 : vector<1x16xf32> to vector<16x16xf32>
    %55 = arith.addf %53, %54 : vector<16x16xf32>
    %cst_28 = arith.constant dense<0xFF800000> : vector<16xf32>
    %56 = vector.multi_reduction <maximumf>, %55, %cst_28 [1] : vector<16x16xf32> to vector<16xf32>
    %57 = vector.shape_cast %56 : vector<16xf32> to vector<16x1xf32>
    %58 = vector.broadcast %57 : vector<16x1xf32> to vector<16x16xf32>
    %59 = arith.subf %55, %58 : vector<16x16xf32>
    %60 = math.exp %59 : vector<16x16xf32>
    %cst_29 = arith.constant dense<0.000000e+00> : vector<16xf32>
    %61 = vector.multi_reduction <add>, %60, %cst_29 [1] : vector<16x16xf32> to vector<16xf32>
    %62 = vector.shape_cast %61 : vector<16xf32> to vector<16x1xf32>
    %63 = tpu.reciprocal %62 {approx = true} : vector<16x1xf32> -> vector<16x1xf32>
    %64 = vector.broadcast %63 : vector<16x1xf32> to vector<16x16xf32>
    %65 = arith.mulf %60, %64 : vector<16x16xf32>
    %66 = arith.truncf %65 : vector<16x16xf32> to vector<16x16xbf16>
    %cst_30 = arith.constant dense<0.000000e+00> : vector<16x4xf32>
    %67 = tpu.matmul %66, %52, %cst_30 {dimension_numbers = #tpu.dot_dimension_numbers<[1], [0], [0], [1], [0, 0, 1, 1], [], []>} : vector<16x16xbf16>, vector<16x4xbf16>, vector<16x4xf32> -> vector<16x4xf32>
    %c0_31 = arith.constant 0 : index
    %c12 = arith.constant 12 : index
    %68 = vector.load %arg6[%c0_31, %c12] : memref<16x96xbf16, #tpu.memory_space<vmem>>, vector<16x4xbf16>
    %c0_32 = arith.constant 0 : index
    %c44 = arith.constant 44 : index
    %69 = vector.load %arg6[%c0_32, %c44] : memref<16x96xbf16, #tpu.memory_space<vmem>>, vector<16x4xbf16>
    %c0_33 = arith.constant 0 : index
    %c76 = arith.constant 76 : index
    %70 = vector.load %arg6[%c0_33, %c76] : memref<16x96xbf16, #tpu.memory_space<vmem>>, vector<16x4xbf16>
    %cst_34 = arith.constant dense<0.000000e+00> : vector<16x16xf32>
    %71 = tpu.matmul %68, %69, %cst_34 {dimension_numbers = #tpu.dot_dimension_numbers<[1], [1], [0], [0], [0, 0, 1, 0], [], []>} : vector<16x4xbf16>, vector<16x4xbf16>, vector<16x16xf32> -> vector<16x16xf32>
    %72 = vector.broadcast %10 : vector<1x16xf32> to vector<16x16xf32>
    %73 = arith.addf %71, %72 : vector<16x16xf32>
    %cst_35 = arith.constant dense<0xFF800000> : vector<16xf32>
    %74 = vector.multi_reduction <maximumf>, %73, %cst_35 [1] : vector<16x16xf32> to vector<16xf32>
    %75 = vector.shape_cast %74 : vector<16xf32> to vector<16x1xf32>
    %76 = vector.broadcast %75 : vector<16x1xf32> to vector<16x16xf32>
    %77 = arith.subf %73, %76 : vector<16x16xf32>
    %78 = math.exp %77 : vector<16x16xf32>
    %cst_36 = arith.constant dense<0.000000e+00> : vector<16xf32>
    %79 = vector.multi_reduction <add>, %78, %cst_36 [1] : vector<16x16xf32> to vector<16xf32>
    %80 = vector.shape_cast %79 : vector<16xf32> to vector<16x1xf32>
    %81 = tpu.reciprocal %80 {approx = true} : vector<16x1xf32> -> vector<16x1xf32>
    %82 = vector.broadcast %81 : vector<16x1xf32> to vector<16x16xf32>
    %83 = arith.mulf %78, %82 : vector<16x16xf32>
    %84 = arith.truncf %83 : vector<16x16xf32> to vector<16x16xbf16>
    %cst_37 = arith.constant dense<0.000000e+00> : vector<16x4xf32>
    %85 = tpu.matmul %84, %70, %cst_37 {dimension_numbers = #tpu.dot_dimension_numbers<[1], [0], [0], [1], [0, 0, 1, 1], [], []>} : vector<16x16xbf16>, vector<16x4xbf16>, vector<16x4xf32> -> vector<16x4xf32>
    %86 = tpu.concatenate %67, %85 in 1 : vector<16x4xf32>, vector<16x4xf32> -> vector<16x8xf32>
    %87 = arith.truncf %86 : vector<16x8xf32> to vector<16x8xbf16>
    %c0_38 = arith.constant 0 : index
    %c8_39 = arith.constant 8 : index
    %88 = vector.load %arg7[%c0_38, %c8_39] : memref<16x32xbf16, #tpu.memory_space<vmem>>, vector<16x8xbf16>
    tpu.vector_store %arg7[%c0_38, %c8_39], %87 {strides = array<i32>} : memref<16x32xbf16, #tpu.memory_space<vmem>>, vector<16x8xbf16>,
    %c0_40 = arith.constant 0 : index
    %c16 = arith.constant 16 : index
    %89 = vector.load %arg6[%c0_40, %c16] : memref<16x96xbf16, #tpu.memory_space<vmem>>, vector<16x4xbf16>
    %c0_41 = arith.constant 0 : index
    %c48 = arith.constant 48 : index
    %90 = vector.load %arg6[%c0_41, %c48] : memref<16x96xbf16, #tpu.memory_space<vmem>>, vector<16x4xbf16>
    %c0_42 = arith.constant 0 : index
    %c80 = arith.constant 80 : index
    %91 = vector.load %arg6[%c0_42, %c80] : memref<16x96xbf16, #tpu.memory_space<vmem>>, vector<16x4xbf16>
    %cst_43 = arith.constant dense<0.000000e+00> : vector<16x16xf32>
    %92 = tpu.matmul %89, %90, %cst_43 {dimension_numbers = #tpu.dot_dimension_numbers<[1], [1], [0], [0], [0, 0, 1, 0], [], []>} : vector<16x4xbf16>, vector<16x4xbf16>, vector<16x16xf32> -> vector<16x16xf32>
    %93 = vector.broadcast %10 : vector<1x16xf32> to vector<16x16xf32>
    %94 = arith.addf %92, %93 : vector<16x16xf32>
    %cst_44 = arith.constant dense<0xFF800000> : vector<16xf32>
    %95 = vector.multi_reduction <maximumf>, %94, %cst_44 [1] : vector<16x16xf32> to vector<16xf32>
    %96 = vector.shape_cast %95 : vector<16xf32> to vector<16x1xf32>
    %97 = vector.broadcast %96 : vector<16x1xf32> to vector<16x16xf32>
    %98 = arith.subf %94, %97 : vector<16x16xf32>
    %99 = math.exp %98 : vector<16x16xf32>
    %cst_45 = arith.constant dense<0.000000e+00> : vector<16xf32>
    %100 = vector.multi_reduction <add>, %99, %cst_45 [1] : vector<16x16xf32> to vector<16xf32>
    %101 = vector.shape_cast %100 : vector<16xf32> to vector<16x1xf32>
    %102 = tpu.reciprocal %101 {approx = true} : vector<16x1xf32> -> vector<16x1xf32>
    %103 = vector.broadcast %102 : vector<16x1xf32> to vector<16x16xf32>
    %104 = arith.mulf %99, %103 : vector<16x16xf32>
    %105 = arith.truncf %104 : vector<16x16xf32> to vector<16x16xbf16>
    %cst_46 = arith.constant dense<0.000000e+00> : vector<16x4xf32>
    %106 = tpu.matmul %105, %91, %cst_46 {dimension_numbers = #tpu.dot_dimension_numbers<[1], [0], [0], [1], [0, 0, 1, 1], [], []>} : vector<16x16xbf16>, vector<16x4xbf16>, vector<16x4xf32> -> vector<16x4xf32>
    %c0_47 = arith.constant 0 : index
    %c20 = arith.constant 20 : index
    %107 = vector.load %arg6[%c0_47, %c20] : memref<16x96xbf16, #tpu.memory_space<vmem>>, vector<16x4xbf16>
    %c0_48 = arith.constant 0 : index
    %c52 = arith.constant 52 : index
    %108 = vector.load %arg6[%c0_48, %c52] : memref<16x96xbf16, #tpu.memory_space<vmem>>, vector<16x4xbf16>
    %c0_49 = arith.constant 0 : index
    %c84 = arith.constant 84 : index
    %109 = vector.load %arg6[%c0_49, %c84] : memref<16x96xbf16, #tpu.memory_space<vmem>>, vector<16x4xbf16>
    %cst_50 = arith.constant dense<0.000000e+00> : vector<16x16xf32>
    %110 = tpu.matmul %107, %108, %cst_50 {dimension_numbers = #tpu.dot_dimension_numbers<[1], [1], [0], [0], [0, 0, 1, 0], [], []>} : vector<16x4xbf16>, vector<16x4xbf16>, vector<16x16xf32> -> vector<16x16xf32>
    %111 = vector.broadcast %10 : vector<1x16xf32> to vector<16x16xf32>
    %112 = arith.addf %110, %111 : vector<16x16xf32>
    %cst_51 = arith.constant dense<0xFF800000> : vector<16xf32>
    %113 = vector.multi_reduction <maximumf>, %112, %cst_51 [1] : vector<16x16xf32> to vector<16xf32>
    %114 = vector.shape_cast %113 : vector<16xf32> to vector<16x1xf32>
    %115 = vector.broadcast %114 : vector<16x1xf32> to vector<16x16xf32>
    %116 = arith.subf %112, %115 : vector<16x16xf32>
    %117 = math.exp %116 : vector<16x16xf32>
    %cst_52 = arith.constant dense<0.000000e+00> : vector<16xf32>
    %118 = vector.multi_reduction <add>, %117, %cst_52 [1] : vector<16x16xf32> to vector<16xf32>
    %119 = vector.shape_cast %118 : vector<16xf32> to vector<16x1xf32>
    %120 = tpu.reciprocal %119 {approx = true} : vector<16x1xf32> -> vector<16x1xf32>
    %121 = vector.broadcast %120 : vector<16x1xf32> to vector<16x16xf32>
    %122 = arith.mulf %117, %121 : vector<16x16xf32>
    %123 = arith.truncf %122 : vector<16x16xf32> to vector<16x16xbf16>
    %cst_53 = arith.constant dense<0.000000e+00> : vector<16x4xf32>
    %124 = tpu.matmul %123, %109, %cst_53 {dimension_numbers = #tpu.dot_dimension_numbers<[1], [0], [0], [1], [0, 0, 1, 1], [], []>} : vector<16x16xbf16>, vector<16x4xbf16>, vector<16x4xf32> -> vector<16x4xf32>
    %125 = tpu.concatenate %106, %124 in 1 : vector<16x4xf32>, vector<16x4xf32> -> vector<16x8xf32>
    %126 = arith.truncf %125 : vector<16x8xf32> to vector<16x8xbf16>
    %c0_54 = arith.constant 0 : index
    %c16_55 = arith.constant 16 : index
    %127 = vector.load %arg7[%c0_54, %c16_55] : memref<16x32xbf16, #tpu.memory_space<vmem>>, vector<16x8xbf16>
    tpu.vector_store %arg7[%c0_54, %c16_55], %126 {strides = array<i32>} : memref<16x32xbf16, #tpu.memory_space<vmem>>, vector<16x8xbf16>,
    %c0_56 = arith.constant 0 : index
    %c24 = arith.constant 24 : index
    %128 = vector.load %arg6[%c0_56, %c24] : memref<16x96xbf16, #tpu.memory_space<vmem>>, vector<16x4xbf16>
    %c0_57 = arith.constant 0 : index
    %c56 = arith.constant 56 : index
    %129 = vector.load %arg6[%c0_57, %c56] : memref<16x96xbf16, #tpu.memory_space<vmem>>, vector<16x4xbf16>
    %c0_58 = arith.constant 0 : index
    %c88 = arith.constant 88 : index
    %130 = vector.load %arg6[%c0_58, %c88] : memref<16x96xbf16, #tpu.memory_space<vmem>>, vector<16x4xbf16>
    %cst_59 = arith.constant dense<0.000000e+00> : vector<16x16xf32>
    %131 = tpu.matmul %128, %129, %cst_59 {dimension_numbers = #tpu.dot_dimension_numbers<[1], [1], [0], [0], [0, 0, 1, 0], [], []>} : vector<16x4xbf16>, vector<16x4xbf16>, vector<16x16xf32> -> vector<16x16xf32>
    %132 = vector.broadcast %10 : vector<1x16xf32> to vector<16x16xf32>
    %133 = arith.addf %131, %132 : vector<16x16xf32>
    %cst_60 = arith.constant dense<0xFF800000> : vector<16xf32>
    %134 = vector.multi_reduction <maximumf>, %133, %cst_60 [1] : vector<16x16xf32> to vector<16xf32>
    %135 = vector.shape_cast %134 : vector<16xf32> to vector<16x1xf32>
    %136 = vector.broadcast %135 : vector<16x1xf32> to vector<16x16xf32>
    %137 = arith.subf %133, %136 : vector<16x16xf32>
    %138 = math.exp %137 : vector<16x16xf32>
    %cst_61 = arith.constant dense<0.000000e+00> : vector<16xf32>
    %139 = vector.multi_reduction <add>, %138, %cst_61 [1] : vector<16x16xf32> to vector<16xf32>
    %140 = vector.shape_cast %139 : vector<16xf32> to vector<16x1xf32>
    %141 = tpu.reciprocal %140 {approx = true} : vector<16x1xf32> -> vector<16x1xf32>
    %142 = vector.broadcast %141 : vector<16x1xf32> to vector<16x16xf32>
    %143 = arith.mulf %138, %142 : vector<16x16xf32>
    %144 = arith.truncf %143 : vector<16x16xf32> to vector<16x16xbf16>
    %cst_62 = arith.constant dense<0.000000e+00> : vector<16x4xf32>
    %145 = tpu.matmul %144, %130, %cst_62 {dimension_numbers = #tpu.dot_dimension_numbers<[1], [0], [0], [1], [0, 0, 1, 1], [], []>} : vector<16x16xbf16>, vector<16x4xbf16>, vector<16x4xf32> -> vector<16x4xf32>
    %c0_63 = arith.constant 0 : index
    %c28 = arith.constant 28 : index
    %146 = vector.load %arg6[%c0_63, %c28] : memref<16x96xbf16, #tpu.memory_space<vmem>>, vector<16x4xbf16>
    %c0_64 = arith.constant 0 : index
    %c60 = arith.constant 60 : index
    %147 = vector.load %arg6[%c0_64, %c60] : memref<16x96xbf16, #tpu.memory_space<vmem>>, vector<16x4xbf16>
    %c0_65 = arith.constant 0 : index
    %c92 = arith.constant 92 : index
    %148 = vector.load %arg6[%c0_65, %c92] : memref<16x96xbf16, #tpu.memory_space<vmem>>, vector<16x4xbf16>
    %cst_66 = arith.constant dense<0.000000e+00> : vector<16x16xf32>
    %149 = tpu.matmul %146, %147, %cst_66 {dimension_numbers = #tpu.dot_dimension_numbers<[1], [1], [0], [0], [0, 0, 1, 0], [], []>} : vector<16x4xbf16>, vector<16x4xbf16>, vector<16x16xf32> -> vector<16x16xf32>
    %150 = vector.broadcast %10 : vector<1x16xf32> to vector<16x16xf32>
    %151 = arith.addf %149, %150 : vector<16x16xf32>
    %cst_67 = arith.constant dense<0xFF800000> : vector<16xf32>
    %152 = vector.multi_reduction <maximumf>, %151, %cst_67 [1] : vector<16x16xf32> to vector<16xf32>
    %153 = vector.shape_cast %152 : vector<16xf32> to vector<16x1xf32>
    %154 = vector.broadcast %153 : vector<16x1xf32> to vector<16x16xf32>
    %155 = arith.subf %151, %154 : vector<16x16xf32>
    %156 = math.exp %155 : vector<16x16xf32>
    %cst_68 = arith.constant dense<0.000000e+00> : vector<16xf32>
    %157 = vector.multi_reduction <add>, %156, %cst_68 [1] : vector<16x16xf32> to vector<16xf32>
    %158 = vector.shape_cast %157 : vector<16xf32> to vector<16x1xf32>
    %159 = tpu.reciprocal %158 {approx = true} : vector<16x1xf32> -> vector<16x1xf32>
    %160 = vector.broadcast %159 : vector<16x1xf32> to vector<16x16xf32>
    %161 = arith.mulf %156, %160 : vector<16x16xf32>
    %162 = arith.truncf %161 : vector<16x16xf32> to vector<16x16xbf16>
    %cst_69 = arith.constant dense<0.000000e+00> : vector<16x4xf32>
    %163 = tpu.matmul %162, %148, %cst_69 {dimension_numbers = #tpu.dot_dimension_numbers<[1], [0], [0], [1], [0, 0, 1, 1], [], []>} : vector<16x16xbf16>, vector<16x4xbf16>, vector<16x4xf32> -> vector<16x4xf32>
    %164 = tpu.concatenate %145, %163 in 1 : vector<16x4xf32>, vector<16x4xf32> -> vector<16x8xf32>
    %165 = arith.truncf %164 : vector<16x8xf32> to vector<16x8xbf16>
    %c0_70 = arith.constant 0 : index
    %c24_71 = arith.constant 24 : index
    %166 = vector.load %arg7[%c0_70, %c24_71] : memref<16x32xbf16, #tpu.memory_space<vmem>>, vector<16x8xbf16>
    tpu.vector_store %arg7[%c0_70, %c24_71], %165 {strides = array<i32>} : memref<16x32xbf16, #tpu.memory_space<vmem>>, vector<16x8xbf16>,
    %c0_72 = arith.constant 0 : index
    %c0_73 = arith.constant 0 : index
    %167 = vector.load %arg7[%c0_72, %c0_73] : memref<16x32xbf16, #tpu.memory_space<vmem>>, vector<16x32xbf16>
    %c0_74 = arith.constant 0 : index
    %c0_75 = arith.constant 0 : index
    %168 = vector.load %arg3[%c0_74, %c0_75] : memref<32x32xbf16, #tpu.memory_space<vmem>>, vector<32x32xbf16>
    %cst_76 = arith.constant dense<0.000000e+00> : vector<16x32xf32>
    %169 = tpu.matmul %167, %168, %cst_76 {dimension_numbers = #tpu.dot_dimension_numbers<[1], [0], [0], [1], [0, 0, 1, 1], [], []>} : vector<16x32xbf16>, vector<32x32xbf16>, vector<16x32xf32> -> vector<16x32xf32>
    %c0_77 = arith.constant 0 : index
    %c0_78 = arith.constant 0 : index
    %170 = vector.load %arg4[%c0_77, %c0_78] : memref<1x32xf32, #tpu.memory_space<vmem>>, vector<1x32xf32>
    %171 = vector.broadcast %170 : vector<1x32xf32> to vector<16x32xf32>
    %172 = arith.addf %169, %171 : vector<16x32xf32>
    %c0_79 = arith.constant 0 : index
    %c0_80 = arith.constant 0 : index
    %173 = vector.load %arg5[%c0_79, %c0_80] : memref<16x32xf32, #tpu.memory_space<vmem>>, vector<16x32xf32>
    tpu.vector_store %arg5[%c0_79, %c0_80], %172 {strides = array<i32>} : memref<16x32xf32, #tpu.memory_space<vmem>>, vector<16x32xf32>,
    return
  }
  func.func @transform_0(%arg0: i32) -> (i32, i32) {
    %c0_i32 = arith.constant 0 : i32
    %c0_i32_0 = arith.constant 0 : i32
    return %arg0, %c0_i32 : i32, i32
  }
  func.func @transform_1(%arg0: i32) -> (i32, i32) {
    %c0_i32 = arith.constant 0 : i32
    %c0_i32_0 = arith.constant 0 : i32
    %c0_i32_1 = arith.constant 0 : i32
    return %c0_i32, %c0_i32_0 : i32, i32
  }
  func.func @transform_2(%arg0: i32) -> (i32, i32) {
    %c0_i32 = arith.constant 0 : i32
    %c0_i32_0 = arith.constant 0 : i32
    %c0_i32_1 = arith.constant 0 : i32
    return %c0_i32, %c0_i32_0 : i32, i32
  }
  func.func @transform_3(%arg0: i32) -> (i32, i32) {
    %c0_i32 = arith.constant 0 : i32
    %c0_i32_0 = arith.constant 0 : i32
    %c0_i32_1 = arith.constant 0 : i32
    return %c0_i32, %c0_i32_0 : i32, i32
  }
  func.func @transform_4(%arg0: i32) -> (i32, i32) {
    %c0_i32 = arith.constant 0 : i32
    %c0_i32_0 = arith.constant 0 : i32
    return %arg0, %c0_i32 : i32, i32
  }
}

</mosaic_0001>

<bundles_post_ra>
// kernel: tpu_custom_call.1
= control target key start
LH: loop header
LB: loop body
LE: loop exit
PB: predicated region body
PF: predicated region fallthrough
CT: control target
= control target key end

     0   :  { %9 = vsyncpa [#allocation5], 0  ;;  %s1990_s0 = inlined_call_operand.hbm [shape: bf16[32,32], index: 0, kind: input, shape index: {}]   ;;  %s1991_s1 = inlined_call_operand.hbm [shape: bf16[32,96], index: 1, kind: input, shape index: {}]   ;;  %s1992_s2 = inlined_call_operand.hbm [shape: bf16[32,32], index: 2, kind: input, shape index: {}]   ;;  %s1993_s3 = inlined_call_operand.vmem [shape: f32[1,32], index: 3, kind: input, shape index: {}]   ;;  %s1994_s4 = inlined_call_operand.hbm [shape: f32[32,32], index: 4, kind: output, shape index: {}]  }
   0x1   :  { %11 = vsyncpa [#allocation5 + $0x1], 0 }
   0x2   :  { %12 = vsyncpa [#allocation8], 0 }
   0x3   :  { %13 = vsyncpa [#allocation6], 0 }
   0x4   :  { %15 = vsyncpa [#allocation6 + $0x1], 0  ;;  %s1597_s15 = smov 0   ;;  %s1599_s16 = smov 0  }
   0x5   :  { %s1601_s17 = smov 0   ;;  %s1603_s18 = smov 0  }
   0x6 LB: > { %s1618_s19 = sadd.s32 4294967295, %s1537_s18   ;;  %s1106_s20 = sadd.s32 4294967294, %s1537_s18   ;;  %s1537_s18 = sphi %s1603_s18, %s2004_s18   ;;  %s1533_s17 = sphi %s1601_s17, %s2003_s17   ;;  %s1529_s16 = sphi %s1599_s16, %s2002_s16   ;;  %s1525_s15 = sphi %s1597_s15, %s2001_s15  }
   0x7   : > { %p41_p0 = scmp.ne.s32.totalorder %s1529_s16, %s1525_s15  ;;  %p42_p1 = scmp.eq.s32.totalorder %s1618_s19, 0 }
   0x8   : > { %p128_p2 = scmp.eq.s32.totalorder %s1618_s19, 1  ;;  %p134_p3 = scmp.eq.s32.totalorder %s1106_s20, 1 }
   0x9   : > { %p1627_p4 = por %p42_p1, %p41_p0  ;;  %p1107_p5 = scmp.ge.s32.totalorder %s1537_s18, 1 }
   0xa   : > { %p1632_p6 = por %p134_p3, %p41_p0  ;;  %p141_p7 = scmp.lt.s32.totalorder %s1537_s18, 3 }
   0xb   : > { %s152_s25 = sshll.u32 %s1991_s1, 4  ;;  %s1539_s27 = smov [#allocation7]   ;;  %s153_s25 = int_to_ptr.hbm [resolvable:$true] %s152_s25 }
   0xc   : > { %p1640_p8 = pnand %p1107_p5, %p141_p7  ;;  %s154_s28 = sshll.u32 %s1539_s27, 4  ;;  %s155_s28 = int_to_ptr.vmem [resolvable:$true] %s154_s28 }
   0xd   : > { %s166_s5 = sshll.u32 %s1992_s2, 4  ;;  %s1540_s6 = smov 64   ;;  %s167_s5 = int_to_ptr.hbm [resolvable:$true] %s166_s5 }
   0xe   : > { %p1206_p9 = pneg %p1640_p8  ;;  %s1541_s7 = smov 4  }
   0xf   : > { %s1542_s8 = smov [#allocation9]   ;;  %s1659_s10 = sadd.s32 1, %s1537_s18  }
  0x10   : > { %p1207_p10 = pnand %p1206_p9, %p42_p1  ;;  %s168_s9 = sshll.u32 %s1542_s8, 4  ;;  %s169_s9 = int_to_ptr.vmem [resolvable:$true] %s168_s9 }
  0x11   : > { %s28_s11 = sadd.s32 1, %s1533_s17  ;;  %s25_s12 = ssub.s32 %s1537_s18, %s1659_s10 }
  0x12   : > { %1209 = dma.hbm_to_vmem [thread:$0]  (!%p1207_p10), %s153_s25, 256, %s155_s28, [#allocation8], %s1540_s6, %s1540_s6, %s1541_s7  }
  0x13   : > { %1212 = dma.hbm_to_vmem [thread:$0]  (!%p1207_p10), %s167_s5, 256, %s169_s9, [#allocation8], %s1540_s6, %s1540_s6, %s1541_s7  }
  0x14   : > { %p35_p12 = scmp.ne.s32.totalorder %s1533_s17, %s1529_s16  ;;  %p26_p13 = scmp.eq.s32.totalorder %s25_s12, 0 }
  0x15   : > { %p36_p0 = scmp.eq.s32.totalorder %s1537_s18, 0  ;;  %p1223_p5 = scmp.lt.s32.totalorder %s1537_s18, 2 }
  0x16   : > { %p1669_p3 = por %p128_p2, %p35_p12  ;;  %s185_s20 = sand.u32 1, %s1533_s17  }
  0x17   : > { %s1675_s14 = scalar_select %p26_p13, %s1533_s17, %s28_s11  }
  0x18   : > { %p37_p7 = por %p36_p0, %p35_p12  ;;  %s1111_s23 = sshll.u32 %s185_s20, 3 }
  0x19   : > { %s1182_s24 = sshll.u32 %s1537_s18, 3  ;;  %s189_s29 = scalar_lea.vmem [#allocation4], %s1111_s23 }
  0x1a   : > { %s194_s28 = scalar_lea.hbm %s1990_s0, %s1182_s24  ;;  %s197_s30 = sshll.u32 %s189_s29, 4  ;;  %s198_s30 = int_to_ptr.vmem [resolvable:$true] %s197_s30 }
  0x1b   : > { %s195_s5 = sshll.u32 %s194_s28, 4  ;;  %p1682_p2 = pnand %p1223_p5, %p37_p7  ;;  %s196_s5 = int_to_ptr.hbm [resolvable:$true] %s195_s5 }
  0x1c   : > { %s186_s9 = scalar_lea.sflag [#allocation5], %s185_s20  ;;  %s1437_s11 = sshra.s32 %s196_s5, 4  ;;  %s1438_s11 = int_to_ptr.hbm [resolvable:$true] %s1437_s11 }
  0x1d   : > { %s1439_s12 = scalar_lea.hbm %s1438_s11, 8  ;;  %p1441_p10 = pneg %p1682_p2 }
  0x1e   : > { %p1440_p9 = scmp.ne.s32.totalorder %s1438_s11, %s1439_s12  ;;  %s1444_s25 = scalar_lea.hbm %s1990_s0, 16 }
  0x1f   : > { %p1445_p0 = scmp.lt.s32.totalorder %s1438_s11, %s1990_s0  ;;  %p1446_p5 = scmp.lt.s32.totalorder %s1444_s25, %s1439_s12 }
  0x20   : > { %p1442_p12 = pnand %p1441_p10, %p1440_p9 }
  0x21   : > { %p1447_p7 = por %p1446_p5, %p1445_p0 }
  0x22   : > { %p1443_p13 = pneg %p1442_p12 }
  0x24   : > { %p1448_p11 = pnand %p1447_p7, %p1443_p13 }
  0x26   : > { %1451 = shalt.err (!%p1448_p11)
}
  0x27   : > { %1216 = dma.hbm_to_vmem [thread:$0]  (!%p1682_p2), %s196_s5, 128, %s198_s30, %s186_s9, %s1540_s6, %s1540_s6, %s1541_s7  }
  0x28   : > { %209 = sbr.rel (%p1640_p8) target bundleno = 1339 (0x53b), region = 36  ;;  %s1702_s20 = sand.u32 (!%p1640_p8), 1, %s1529_s16  }
  0x29   : > { %s1115_s29 = sshll.u32 (!%p1640_p8), %s1702_s20, 3  ;;  %s212_s11 = scalar_lea.sflag (!%p1640_p8), [#allocation5], %s1702_s20 }
  0x2a   : > { %s215_s12 = scalar_lea.vmem (!%p1640_p8), [#allocation4], %s1115_s29 }
  0x2d   : > { %1512 = dma.done.wait (%p1627_p4), %s212_s11, 128  }
  0x2e   : > { %1514 = vsyncadd (%p1627_p4), %s212_s11, 4294967168 }
  0x2f   : > { %1516 = dma.done.wait (%p42_p1), [#allocation8], 512  }
  0x30   : > { %1518 = vsyncadd (%p42_p1), [#allocation8], 4294966784  ;;  %v1185_v0 = vld [vmem:[#allocation7 + $0x8] sm:$0xff]  ;;  %v1184_v1 = vld [vmem:[#allocation7] sm:$0xff]  ;;  %vm277_vm0 = vcmask 261120   ;;  %vm297_vm1 = vcmask 781312   ;;  %v300_v36 = vlaneseq }
  0x31   : > { %287 = vmatpush.bf16.msra.mxu0 %v1185_v0  ;;  %v1183_v2 = vld [vmem:[%s215_s12] sm:$0xff]  ;;  %s1543_s21 = smov 116   ;;  %s1544_s26 = smov 124   ;;  %vm313_vm2 = vcmask 31744   ;;  %v1560_v38 = vmov -1e+30  }
  0x32   : > { %s1545_s6 = smov 96   ;;  %s1546_s7 = smov 76   ;;  %v301_v37 = vand.u32 127, %v300_v36  ;;  %vm334_vm4 = vcmask 130048   ;;  %vm457_vm5 = vcmask 60416   ;;  %vm621_vm6 = vcmask 126016  }
  0x33   : > { %s1547_s30 = smov 84   ;;  %s1548_s5 = smov 92   ;;  %vm785_vm7 = vcmask 191616   ;;  %vm949_vm8 = vcmask 257216  }
  0x34   : > { %s1549_s8 = smov 100   ;;  %s1550_s9 = smov 68   ;;  %vm302_vm3 = vcmp.lt.s32.totalorder %v301_v37, 13 }
  0x35   : > { %288 = vmatpush.bf16.msra.mxu0 %v1184_v1  ;;  %s1551_s24 = smov 108   ;;  %s1552_s23 = smov 80   ;;  %v1749_v39 = vsel %vm302_vm3, 0.0, %v1560_v38 }
  0x36   : > { %s1553_s25 = smov 120   ;;  %s1554_s27 = smov 88  }
  0x37   : > { %s1555_s28 = smov 104   ;;  %s1556_s29 = smov 72  }
  0x38   : > { %1131 = vmatmul.msk.bf16.vlgmr.msra.gmra.mxu0 %vm277_vm0, %v1183_v2  ;;  %s1557_s11 = smov 112   ;;  %s1558_s12 = smov 60  }
  0xb5   : > { %v290_v3 = vpop.f32.mrf.mxu0 }
  0xb6   : > { %v295_v4 = vpack.c.bf16 %v290_v3, %v290_v3 }
  0xb8   : > { %298 = vst.msk [vmem:[#allocation2] sm:$0xf] %vm297_vm1, %v295_v4 }
  0xbd   : > { %v292_v5 = vpop.f32.mrf.mxu0 }
  0xbe   : > { %v296_v6 = vpack.c.bf16 %v292_v5, %v292_v5 }
  0xc0   : > { %299 = vst.msk [vmem:[#allocation2 + $0x4] sm:$0xf] %vm297_vm1, %v296_v6 }
  0xc7   : > { %v1715_v7 = vld [vmem:[#allocation2] sm:$0xff] }
  0xc8   : > { %v1186_v8 = vld [vmem:[#allocation2] sm:$0xff]  ;;  %534 = vrot.lane.b32.xlu2 %v1715_v7, %s1543_s21  ;;  %s1559_s21 = smov 64  }
  0xc9   : > { %378 = vrot.lane.b32.xlu1 %v1186_v8, %s1544_s26  ;;  %311 = vrot.lane.b32.xlu0 %v1186_v8, %s1545_s6  ;;  %v1718_v9 = vld [vmem:[#allocation2] sm:$0xff]  ;;  %s1561_s26 = smov 52   ;;  %s1562_s6 = smov 56  }
  0xca   : > { %v1722_v10 = vld [vmem:[#allocation2] sm:$0xff] }
  0xd0   : > { %700 = vrot.lane.b32.xlu2 %v1718_v9, %s1546_s7  ;;  %s1563_s7 = smov 44  }
  0xd1   : > { %536 = vrot.lane.b32.xlu1 %v1715_v7, %s1547_s30  ;;  %380 = vrot.lane.b32.xlu0 %v1186_v8, %s1548_s5  ;;  %s1564_s30 = smov 36   ;;  %s1565_s5 = smov 48  }
  0xd8   : > { %862 = vrot.lane.b32.xlu2 %v1722_v10, %s1549_s8  ;;  %s1566_s8 = smov 40  }
  0xd9   : > { %864 = vrot.lane.b32.xlu1 %v1722_v10, %s1550_s9  ;;  %698 = vrot.lane.b32.xlu0 %v1718_v9, %s1551_s24  ;;  %s1567_s9 = smov 4   ;;  %s1568_s24 = smov 8  }
  0xe0   : > { %633 = vrot.lane.b32.xlu2 %v1718_v9, %s1552_s23  ;;  %s1569_s23 = smov 16  }
  0xe1   : > { %467 = vrot.lane.b32.xlu1 %v1715_v7, %s1553_s25  ;;  %469 = vrot.lane.b32.xlu0 %v1715_v7, %s1554_s27  ;;  %s1570_s25 = smov 24   ;;  %s1118_s27 = sshll.u32 %s1702_s20, 4 }
  0xe8   : > { %795 = vrot.lane.b32.xlu2 %v1722_v10, %s1555_s28 }
  0xe9   : > { %797 = vrot.lane.b32.xlu1 %v1722_v10, %s1556_s29  ;;  %631 = vrot.lane.b32.xlu0 %v1718_v9, %s1557_s11  ;;  %s1193_s11 = sshll.u32 %s1618_s19, 4 }
  0xf1   : > { %425 = vrot.lane.b32.xlu1 %v1186_v8, %s1558_s12  ;;  %358 = vrot.lane.b32.xlu0 %v1186_v8, %s1559_s21  ;;  %s250_s12 = scalar_lea.vmem [#allocation10], %s1118_s27 }
 0x122   : > { %v535_v11 = vpop.permute.xlu2 %534 }
 0x12a   : > { %v701_v15 = vpop.permute.xlu2 %700 }
 0x12b   : > { %v706_v23 = vsel %vm313_vm2, %v701_v15, 0 }
 0x132   : > { %v863_v20 = vpop.permute.xlu2 %862 }
 0x13a   : > { %v634_v24 = vpop.permute.xlu2 %633 }
 0x13b   : > { %v379_v12 = vpop.permute.xlu1 %378  ;;  %v312_v13 = vpop.permute.xlu0 %311  ;;  %v639_v28 = vsel %vm313_vm2, %v634_v24, 0 }
 0x13c   : > { %v318_v14 = vsel %vm313_vm2, %v312_v13, 0 }
 0x13d   : > { %327 = vmatpush.bf16.xpose.msra.mxu1 %v318_v14 }
 0x142   : > { %v796_v35 = vpop.permute.xlu2 %795 }
 0x143   : > { %v537_v16 = vpop.permute.xlu1 %536  ;;  %v381_v17 = vpop.permute.xlu0 %380 }
 0x144   : > { %v542_v18 = vsel %vm313_vm2, %v537_v16, 0  ;;  %1136 = vmatmul.msk.bf16.vlgmr.msra.gmra.mxu1 %vm313_vm2, %v1186_v8  ;;  %v386_v19 = vsel %vm313_vm2, %v381_v17, 0 }
 0x145   : > { %395 = vmatpush.bf16.xpose.msra.mxu3 %v386_v19 }
 0x14b   : > { %v865_v21 = vpop.permute.xlu1 %864  ;;  %v699_v22 = vpop.permute.xlu0 %698 }
 0x14c   : > { %1138 = vmatmul.msk.bf16.vlgmr.msra.gmra.mxu3 %vm313_vm2, %v379_v12  ;;  %v870_v32 = vsel %vm313_vm2, %v865_v21, 0 }
 0x14d   : > { %551 = vmatpush.bf16.xpose.msrb.mxu3 %v542_v18 }
 0x153   : > { %v468_v25 = vpop.permute.xlu1 %467  ;;  %v470_v26 = vpop.permute.xlu0 %469 }
 0x154   : > { %v475_v27 = vsel %vm313_vm2, %v470_v26, 0 }
 0x155   : > { %715 = vmatpush.bf16.xpose.msra.mxu3 %v706_v23  ;;  %484 = vmatpush.bf16.xpose.msrb.mxu0 %v475_v27 }
 0x15b   : > { %v798_v29 = vpop.permute.xlu1 %797  ;;  %v632_v31 = vpop.permute.xlu0 %631 }
 0x15c   : > { %v803_v30 = vsel %vm313_vm2, %v798_v29, 0  ;;  %1144 = vmatmul.msk.bf16.vlgmr.msrb.gmra.mxu0 %vm313_vm2, %v468_v25  ;;  %1146 = vmatmul.msk.bf16.vlgmr.msrb.gmra.mxu3 %vm313_vm2, %v535_v11 }
 0x15d   : > { %648 = vmatpush.bf16.xpose.msra.mxu0 %v639_v28  ;;  %879 = vmatpush.bf16.xpose.msrb.mxu3 %v870_v32 }
 0x163   : > { %v426_v33 = vpop.permute.xlu1 %425  ;;  %v359_v34 = vpop.permute.xlu0 %358 }
 0x164   : > { %371 = vmatpush.bf16.msra.mxu2 %v359_v34 }
 0x165   : > { %812 = vmatpush.bf16.xpose.msrb.mxu0 %v803_v30 }
 0x168   : > { %438 = vmatpush.bf16.msrb.mxu2 %v426_v33 }
 0x16c   : > { %1152 = vmatmul.msk.bf16.vlgmr.msra.gmra.mxu0 %vm313_vm2, %v632_v31  ;;  %1154 = vmatmul.msk.bf16.vlgmr.msra.gmra.mxu3 %vm313_vm2, %v699_v22 }
 0x17c   : > { %1160 = vmatmul.msk.bf16.vlgmr.msrb.gmra.mxu0 %vm313_vm2, %v796_v35  ;;  %1162 = vmatmul.msk.bf16.vlgmr.msrb.gmra.mxu3 %vm313_vm2, %v863_v20 }
 0x1c1   : > { %v329_v40 = vpop.f32.mrf.mxu1 }
 0x1c2   : > { %v330_v41 = vadd.f32 %v329_v40, %v1749_v39 }
 0x1c4   : > { %v335_v42 = vsel %vm334_vm4, %v330_v41, -inf }
 0x1c5   : > { %336 = vmax.xlane.f32.xlu0 %v335_v42 }
 0x1c9   : > { %v331_v43 = vpop.f32.mrf.mxu1 }
 0x1ca   : > { %v1754_v44 = vadd.f32 %v331_v43, %v1749_v39 }
 0x1cc   : > { %v338_v45 = vsel %vm334_vm4, %v1754_v44, -inf }
 0x1cd   : > { %339 = vmax.xlane.f32.xlu1 %v338_v45 }
 0x1cf   : > { %v397_v46 = vpop.f32.mrf.mxu3 }
 0x1d0   : > { %v1759_v47 = vadd.f32 %v397_v46, %v1749_v39 }
 0x1d2   : > { %v402_v48 = vsel %vm334_vm4, %v1759_v47, -inf }
 0x1d3   : > { %403 = vmax.xlane.f32.xlu2 %v402_v48 }
 0x1d7   : > { %v399_v49 = vpop.f32.mrf.mxu3 }
 0x1d8   : > { %v1779_v60 = vadd.f32 %v399_v49, %v1749_v39 }
 0x1d9   : > { %v486_v50 = vpop.f32.mrf.mxu0 }
 0x1da   : > { %v1764_v51 = vadd.f32 %v486_v50, %v1749_v39  ;;  %v405_v0 = vsel %vm334_vm4, %v1779_v60, -inf }
 0x1dc   : > { %v491_v52 = vsel %vm334_vm4, %v1764_v51, -inf }
 0x1dd   : > { %492 = vmax.xlane.f32.xlu0 %v491_v52 }
 0x1df   : > { %v553_v53 = vpop.f32.mrf.mxu3 }
 0x1e0   : > { %v1769_v54 = vadd.f32 %v553_v53, %v1749_v39 }
 0x1e1   : > { %v488_v55 = vpop.f32.mrf.mxu0 }
 0x1e2   : > { %v1772_v56 = vadd.f32 %v488_v55, %v1749_v39  ;;  %v558_v58 = vsel %vm334_vm4, %v1769_v54, -inf }
 0x1e4   : > { %v494_v57 = vsel %vm334_vm4, %v1772_v56, -inf }
 0x1e5   : > { %495 = vmax.xlane.f32.xlu2 %v494_v57  ;;  %559 = vmax.xlane.f32.xlu0 %v558_v58 }
 0x1e7   : > { %v555_v59 = vpop.f32.mrf.mxu3 }
 0x1e8   : > { %v1782_v61 = vadd.f32 %v555_v59, %v1749_v39 }
 0x1e9   : > { %v650_v62 = vpop.f32.mrf.mxu0 }
 0x1ea   : > { %v561_v63 = vsel %vm334_vm4, %v1782_v61, -inf  ;;  %v1821_v23 = vadd.f32 %v650_v62, %v1749_v39 }
 0x1eb   : > { %562 = vmax.xlane.f32.xlu1 %v561_v63 }
 0x1ec   : > { %v655_v24 = vsel %vm334_vm4, %v1821_v23, -inf }
 0x1ed   : > { %406 = vmax.xlane.f32.xlu2 %v405_v0 }
 0x1ef   : > { %v717_v1 = vpop.f32.mrf.mxu3 }
 0x1f0   : > { %v1789_v2 = vadd.f32 %v717_v1, %v1749_v39 }
 0x1f1   : > { %v1791_v3 = vpop.f32.mrf.mxu0 }
 0x1f2   : > { %v722_v4 = vsel %vm334_vm4, %v1789_v2, -inf }
 0x1f5   : > { %723 = vmax.xlane.f32.xlu2 %v722_v4 }
 0x1f7   : > { %v719_v5 = vpop.f32.mrf.mxu3 }
 0x1f8   : > { %v1796_v6 = vadd.f32 %v719_v5, %v1749_v39 }
 0x1f9   : > { %v814_v8 = vpop.f32.mrf.mxu0 }
 0x1fa   : > { %v725_v11 = vsel %vm334_vm4, %v1796_v6, -inf  ;;  %v1801_v12 = vadd.f32 %v814_v8, %v1749_v39 }
 0x1fb   : > { %726 = vmax.xlane.f32.xlu0 %v725_v11 }
 0x1fc   : > { %v819_v16 = vsel %vm334_vm4, %v1801_v12, -inf }
 0x1ff   : > { %v881_v13 = vpop.f32.mrf.mxu3 }
 0x200   : > { %v1804_v14 = vadd.f32 %v881_v13, %v1749_v39 }
 0x201   : > { %v816_v17 = vpop.f32.mrf.mxu0 }
 0x202   : > { %v886_v15 = vsel %vm334_vm4, %v1804_v14, -inf  ;;  %v1811_v18 = vadd.f32 %v816_v17, %v1749_v39 }
 0x203   : > { %887 = vmax.xlane.f32.xlu1 %v886_v15  ;;  %820 = vmax.xlane.f32.xlu0 %v819_v16  ;;  %v1873_v15 = vadd.f32 %v1791_v3, %v1749_v39 }
 0x204   : > { %v822_v22 = vsel %vm334_vm4, %v1811_v18, -inf }
 0x207   : > { %v883_v19 = vpop.f32.mrf.mxu3 }
 0x208   : > { %v1814_v20 = vadd.f32 %v883_v19, %v1749_v39 }
 0x20a   : > { %v889_v21 = vsel %vm334_vm4, %v1814_v20, -inf }
 0x20b   : > { %890 = vmax.xlane.f32.xlu2 %v889_v21  ;;  %823 = vmax.xlane.f32.xlu0 %v822_v22 }
 0x213   : > { %656 = vmax.xlane.f32.xlu2 %v655_v24 }
 0x238   : > { %v337_v25 = vpop.xlane.xlu0 %336 }
 0x239   : > { %v341_v26 = vsub.f32 %v330_v41, %v337_v25 }
 0x23b   : > { %v343_v27 = vmul.f32 1.442695, %v341_v26 }
 0x23d   : > { %1313 = vpow2.f32 %v343_v27 }
 0x240   : > { %v340_v28 = vpop.xlane.xlu1 %339 }
 0x241   : > { %v342_v29 = vsub.f32 %v1754_v44, %v340_v28 }
 0x243   : > { %v1826_v30 = vpop.eup %1313  ;;  %v345_v31 = vmul.f32 1.442695, %v342_v29 }
 0x244   : > { %v347_v32 = vsel %vm334_vm4, %v1826_v30, 0.0 }
 0x245   : > { %1315 = vpow2.f32 %v345_v31  ;;  %348 = vadd.xlane.f32.xlu1 %v347_v32 }
 0x246   : > { %v404_v33 = vpop.xlane.xlu2 %403 }
 0x247   : > { %v408_v34 = vsub.f32 %v1759_v47, %v404_v33 }
 0x249   : > { %v410_v35 = vmul.f32 1.442695, %v408_v34 }
 0x24b   : > { %v1831_v36 = vpop.eup %1315  ;;  %1317 = vpow2.f32 %v410_v35 }
 0x24c   : > { %v350_v37 = vsel %vm334_vm4, %v1831_v36, 0.0 }
 0x24d   : > { %351 = vadd.xlane.f32.xlu2 %v350_v37 }
 0x250   : > { %v493_v38 = vpop.xlane.xlu0 %492 }
 0x251   : > { %v1835_v40 = vpop.eup %1317  ;;  %v497_v41 = vsub.f32 %v1764_v51, %v493_v38 }
 0x252   : > { %v414_v42 = vsel %vm334_vm4, %v1835_v40, 0.0 }
 0x253   : > { %v499_v43 = vmul.f32 1.442695, %v497_v41  ;;  %415 = vadd.xlane.f32.xlu1 %v414_v42 }
 0x255   : > { %1319 = vpow2.f32 %v499_v43 }
 0x258   : > { %v496_v44 = vpop.xlane.xlu2 %495  ;;  %v560_v49 = vpop.xlane.xlu0 %559 }
 0x259   : > { %v498_v45 = vsub.f32 %v1772_v56, %v496_v44  ;;  %v564_v53 = vsub.f32 %v1769_v54, %v560_v49 }
 0x25b   : > { %v1841_v46 = vpop.eup %1319  ;;  %v501_v47 = vmul.f32 1.442695, %v498_v45  ;;  %v566_v57 = vmul.f32 1.442695, %v564_v53 }
 0x25c   : > { %v503_v48 = vsel %vm334_vm4, %v1841_v46, 0.0 }
 0x25d   : > { %1321 = vpow2.f32 %v501_v47  ;;  %504 = vadd.xlane.f32.xlu0 %v503_v48 }
 0x25e   : > { %v563_v58 = vpop.xlane.xlu1 %562 }
 0x25f   : > { %v565_v62 = vsub.f32 %v1782_v61, %v563_v58 }
 0x260   : > { %v407_v50 = vpop.xlane.xlu2 %406 }
 0x261   : > { %v409_v51 = vsub.f32 %v1779_v60, %v407_v50  ;;  %v568_v54 = vmul.f32 1.442695, %v565_v62 }
 0x263   : > { %v1846_v52 = vpop.eup %1321  ;;  %v412_v55 = vmul.f32 1.442695, %v409_v51 }
 0x264   : > { %v506_v56 = vsel %vm334_vm4, %v1846_v52, 0.0 }
 0x265   : > { %1323 = vpow2.f32 %v412_v55  ;;  %507 = vadd.xlane.f32.xlu0 %v506_v56 }
 0x266   : > { %1325 = vpow2.f32 %v566_v57 }
 0x267   : > { %1327 = vpow2.f32 %v568_v54 }
 0x268   : > { %v724_v63 = vpop.xlane.xlu2 %723 }
 0x269   : > { %v728_v1 = vsub.f32 %v1789_v2, %v724_v63 }
 0x26b   : > { %v1851_v59 = vpop.eup %1323  ;;  %v730_v5 = vmul.f32 1.442695, %v728_v1 }
 0x26c   : > { %581 = vrot.lane.b32.xlu1 %v1715_v7, %s1561_s26  ;;  %v417_v60 = vsel %vm334_vm4, %v1851_v59, 0.0  ;;  %v1857_v0 = vpop.eup %1325 }
 0x26d   : > { %418 = vadd.xlane.f32.xlu2 %v417_v60  ;;  %v570_v4 = vsel %vm334_vm4, %v1857_v0, 0.0  ;;  %v1862_v61 = vpop.eup %1327  ;;  %1329 = vpow2.f32 %v730_v5 }
 0x26e   : > { %v573_v8 = vsel %vm334_vm4, %v1862_v61, 0.0  ;;  %v727_v13 = vpop.xlane.xlu0 %726 }
 0x26f   : > { %v729_v16 = vsub.f32 %v1796_v6, %v727_v13 }
 0x271   : > { %v732_v17 = vmul.f32 1.442695, %v729_v16 }
 0x273   : > { %v1867_v11 = vpop.eup %1329  ;;  %1331 = vpow2.f32 %v732_v17 }
 0x274   : > { %v734_v2 = vsel %vm334_vm4, %v1867_v11, 0.0 }
 0x275   : > { %571 = vadd.xlane.f32.xlu2 %v570_v4 }
 0x276   : > { %v888_v19 = vpop.xlane.xlu1 %887  ;;  %v1891_v31 = vpop.xlane.xlu0 %820 }
 0x277   : > { %v892_v21 = vsub.f32 %v1804_v14, %v888_v19 }
 0x279   : > { %514 = vrot.lane.b32.xlu0 %v1715_v7, %s1562_s6  ;;  %v658_v7 = vsel %vm334_vm4, %v1873_v15, -inf  ;;  %v894_v22 = vmul.f32 1.442695, %v892_v21  ;;  %v1880_v24 = vpop.eup %1331  ;;  %s1010_s6 = scalar_lea.hbm %s1994_s4, %s1193_s11 }
 0x27a   : > { %v737_v39 = vsel %vm334_vm4, %v1880_v24, 0.0 }
 0x27b   : > { %1333 = vpow2.f32 %v894_v22 }
 0x27d   : > { %574 = vadd.xlane.f32.xlu2 %v573_v8 }
 0x27e   : > { %v891_v25 = vpop.xlane.xlu2 %890 }
 0x27f   : > { %v893_v14 = vsub.f32 %v1814_v20, %v891_v25 }
 0x281   : > { %v1884_v3 = vpop.eup %1333  ;;  %v896_v26 = vmul.f32 1.442695, %v893_v14 }
 0x282   : > { %v898_v6 = vsel %vm334_vm4, %v1884_v3, 0.0 }
 0x283   : > { %1335 = vpow2.f32 %v896_v26 }
 0x285   : > { %735 = vadd.xlane.f32.xlu2 %v734_v2 }
 0x286   : > { %v657_v27 = vpop.xlane.xlu2 %656 }
 0x287   : > { %v661_v35 = vsub.f32 %v1821_v23, %v657_v27 }
 0x289   : > { %v1893_v32 = vpop.eup %1335  ;;  %v663_v42 = vmul.f32 1.442695, %v661_v35 }
 0x28a   : > { %v901_v34 = vsel %vm334_vm4, %v1893_v32, 0.0 }
 0x296   : > { %659 = vmax.xlane.f32.xlu1 %v658_v7  ;;  %v825_v7 = vsub.f32 %v1801_v12, %v1891_v31 }
 0x298   : > { %v827_v21 = vmul.f32 1.442695, %v825_v7 }
 0x29d   : > { %745 = vrot.lane.b32.xlu2 %v1718_v9, %s1563_s7  ;;  %s1011_s7 = sshll.u32 %s250_s12, 4  ;;  %s1012_s7 = int_to_ptr.vmem [resolvable:$true] %s1011_s7 }
 0x2a3   : > { %738 = vadd.xlane.f32.xlu0 %v737_v39 }
 0x2ab   : > { %899 = vadd.xlane.f32.xlu0 %v898_v6 }
 0x2af   : > { %909 = vrot.lane.b32.xlu1 %v1722_v10, %s1564_s30  ;;  %s1013_s30 = sshll.u32 %s1010_s6, 4  ;;  %s1014_s30 = int_to_ptr.hbm [resolvable:$true] %s1013_s30 }
 0x2b8   : > { %v349_v28 = vpop.xlane.xlu1 %348 }
 0x2b9   : > { %1337 = vrcp.f32 %v349_v28 }
 0x2bf   : > { %678 = vrot.lane.b32.xlu0 %v1718_v9, %s1565_s5  ;;  %v1338_v33 = vpop.eup %1337  ;;  %v824_v9 = vpop.xlane.xlu0 %823  ;;  %s999_s5 = scalar_lea.sflag [#allocation6], %s1702_s20 }
 0x2c0   : > { %v352_v29 = vpop.xlane.xlu2 %351  ;;  %v355_v37 = vmul.f32 %v1338_v33, %v1826_v30  ;;  %v826_v45 = vsub.f32 %v1811_v18, %v824_v9 }
 0x2c1   : > { %1339 = vrcp.f32 %v352_v29 }
 0x2c2   : > { %1341 = vpow2.f32 %v663_v42  ;;  %v829_v23 = vmul.f32 1.442695, %v826_v45 }
 0x2c4   : > { %1343 = vpow2.f32 %v829_v23 }
 0x2c6   : > { %902 = vadd.xlane.f32.xlu2 %v901_v34  ;;  %v416_v47 = vpop.xlane.xlu1 %415 }
 0x2c7   : > { %v1340_v20 = vpop.eup %1339  ;;  %1345 = vrcp.f32 %v416_v47 }
 0x2c8   : > { %v356_v38 = vmul.f32 %v1340_v20, %v1831_v36  ;;  %v1901_v44 = vpop.eup %1341 }
 0x2c9   : > { %v667_v48 = vsel %vm334_vm4, %v1901_v44, 0.0 }
 0x2ca   : > { %v357_v41 = vpack.c.bf16 %v356_v38, %v355_v37  ;;  %v1906_v50 = vpop.eup %1343 }
 0x2cb   : > { %v834_v62 = vsel %vm334_vm4, %v1906_v50, 0.0 }
 0x2cc   : > { %1137 = vmatmul.msk.bf16.vlgmr.msra.gmra.mxu2 %vm334_vm4, %v357_v41 }
 0x2cd   : > { %v1346_v51 = vpop.eup %1345 }
 0x2ce   : > { %v422_v56 = vmul.f32 %v1346_v51, %v1835_v40 }
 0x2d0   : > { %v505_v43 = vpop.xlane.xlu0 %504 }
 0x2d8   : > { %v508_v30 = vpop.xlane.xlu0 %507 }
 0x2d9   : > { %668 = vadd.xlane.f32.xlu1 %v667_v48  ;;  %1347 = vrcp.f32 %v508_v30 }
 0x2de   : > { %v582_v36 = vpop.permute.xlu1 %581 }
 0x2df   : > { %594 = vmatpush.bf16.msra.mxu2 %v582_v36  ;;  %v1348_v53 = vpop.eup %1347 }
 0x2e0   : > { %v419_v49 = vpop.xlane.xlu2 %418  ;;  %v512_v60 = vmul.f32 %v1348_v53, %v1846_v52 }
 0x2e1   : > { %1349 = vrcp.f32 %v419_v49 }
 0x2e2   : > { %1351 = vrcp.f32 %v505_v43 }
 0x2e7   : > { %v1350_v18 = vpop.eup %1349 }
 0x2e8   : > { %v1352_v55 = vpop.eup %1351  ;;  %v423_v57 = vmul.f32 %v1350_v18, %v1851_v59  ;;  %v572_v58 = vpop.xlane.xlu2 %571 }
 0x2e9   : > { %835 = vadd.xlane.f32.xlu0 %v834_v62  ;;  %v511_v63 = vmul.f32 %v1352_v55, %v1841_v46  ;;  %1353 = vrcp.f32 %v572_v58 }
 0x2ea   : > { %v424_v54 = vpack.c.bf16 %v423_v57, %v422_v56 }
 0x2eb   : > { %v515_v1 = vpop.permute.xlu0 %514  ;;  %v513_v4 = vpack.c.bf16 %v512_v60, %v511_v63 }
 0x2ec   : > { %1139 = vmatmul.msk.bf16.vlgmr.msrb.gmra.mxu2 %vm334_vm4, %v424_v54  ;;  %527 = vmatpush.bf16.msrb.mxu1 %v515_v1 }
 0x2ef   : > { %1145 = vmatmul.msk.bf16.vlgmr.msrb.gmra.mxu1 %vm334_vm4, %v513_v4  ;;  %v1354_v59 = vpop.eup %1353 }
 0x2f0   : > { %v575_v40 = vpop.xlane.xlu2 %574  ;;  %v578_v8 = vmul.f32 %v1354_v59, %v1857_v0 }
 0x2f1   : > { %1355 = vrcp.f32 %v575_v40 }
 0x2f7   : > { %v1356_v5 = vpop.eup %1355 }
 0x2f8   : > { %v579_v52 = vmul.f32 %v1356_v5, %v1862_v61  ;;  %v736_v2 = vpop.xlane.xlu2 %735 }
 0x2fa   : > { %v580_v13 = vpack.c.bf16 %v579_v52, %v578_v8 }
 0x2fc   : > { %1147 = vmatmul.msk.bf16.vlgmr.msra.gmra.mxu2 %vm334_vm4, %v580_v13 }
 0x300   : > { %v746_v46 = vpop.permute.xlu2 %745 }
 0x301   : > { %758 = vmatpush.bf16.msrb.mxu2 %v746_v46 }
 0x309   : > { %v660_v16 = vpop.xlane.xlu1 %659 }
 0x30a   : > { %v662_v17 = vsub.f32 %v1873_v15, %v660_v16 }
 0x30c   : > { %v665_v19 = vmul.f32 1.442695, %v662_v17 }
 0x30e   : > { %1357 = vpow2.f32 %v665_v19 }
 0x30f   : > { %1359 = vpow2.f32 %v827_v21 }
 0x310   : > { %1361 = vrcp.f32 %v736_v2 }
 0x314   : > { %v1358_v22 = vpop.eup %1357 }
 0x315   : > { %v670_v0 = vsel %vm334_vm4, %v1358_v22, 0.0  ;;  %v1360_v39 = vpop.eup %1359 }
 0x316   : > { %671 = vadd.xlane.f32.xlu2 %v670_v0  ;;  %v739_v61 = vpop.xlane.xlu0 %738  ;;  %v1362_v6 = vpop.eup %1361  ;;  %v831_v14 = vsel %vm334_vm4, %v1360_v39, 0.0 }
 0x317   : > { %1363 = vrcp.f32 %v739_v61  ;;  %v742_v15 = vmul.f32 %v1362_v6, %v1867_v11 }
 0x31d   : > { %v1364_v25 = vpop.eup %1363 }
 0x31e   : > { %v743_v12 = vmul.f32 %v1364_v25, %v1880_v24  ;;  %832 = vadd.xlane.f32.xlu2 %v831_v14  ;;  %v900_v28 = vpop.xlane.xlu0 %899 }
 0x31f   : > { %1365 = vrcp.f32 %v900_v28 }
 0x320   : > { %v744_v26 = vpack.c.bf16 %v743_v12, %v742_v15 }
 0x321   : > { %v910_v27 = vpop.permute.xlu1 %909 }
 0x322   : > { %1155 = vmatmul.msk.bf16.vlgmr.msrb.gmra.mxu2 %vm334_vm4, %v744_v26 }
 0x323   : > { %922 = vmatpush.bf16.msra.mxu2 %v910_v27 }
 0x325   : > { %v1366_v33 = vpop.eup %1365 }
 0x326   : > { %v906_v11 = vmul.f32 %v1366_v33, %v1884_v3 }
 0x331   : > { %v679_v29 = vpop.permute.xlu0 %678 }
 0x332   : > { %691 = vmatpush.bf16.msra.mxu1 %v679_v29 }
 0x336   : > { %842 = vrot.lane.b32.xlu2 %v1722_v10, %s1566_s8  ;;  %s1481_s8 = sshra.s32 %s1014_s30, 4  ;;  %s1482_s8 = int_to_ptr.hbm [resolvable:$true] %s1481_s8 }
 0x337   : > { %s1483_s19 = scalar_lea.hbm %s1482_s8, 16  ;;  %p1488_p11 = scmp.lt.s32.totalorder %s1482_s8, %s1994_s4 }
 0x338   : > { %p1484_p1 = scmp.ne.s32.totalorder %s1482_s8, %s1483_s19 }
 0x339   : > { %v903_v31 = vpop.xlane.xlu2 %902 }
 0x33a   : > { %1367 = vrcp.f32 %v903_v31  ;;  %p1485_p4 = pnand %p1484_p1, %p1669_p3 }
 0x33c   : > { %p1486_p8 = pneg %p1485_p4 }
 0x340   : > { %v1368_v34 = vpop.eup %1367 }
 0x341   : > { %v907_v24 = vmul.f32 %v1368_v34, %v1893_v32 }
 0x343   : > { %v908_v20 = vpack.c.bf16 %v907_v24, %v906_v11 }
 0x345   : > { %1163 = vmatmul.msk.bf16.vlgmr.msra.gmra.mxu2 %vm334_vm4, %v908_v20 }
 0x34c   : > { %v669_v42 = vpop.xlane.xlu1 %668 }
 0x34d   : > { %1369 = vrcp.f32 %v669_v42 }
 0x34f   : > { %v373_v35 = vpop.f32.mrf.mxu2 }
 0x353   : > { %v1370_v3 = vpop.eup %1369 }
 0x354   : > { %v675_v48 = vmul.f32 %v1370_v3, %v1901_v44 }
 0x357   : > { %v375_v37 = vpop.f32.mrf.mxu2 }
 0x35c   : > { %v836_v49 = vpop.xlane.xlu0 %835 }
 0x36c   : > { %v529_v52 = vpop.f32.mrf.mxu1 }
 0x36f   : > { %v440_v38 = vpop.f32.mrf.mxu2 }
 0x374   : > { %v531_v16 = vpop.f32.mrf.mxu1 }
 0x377   : > { %v442_v41 = vpop.f32.mrf.mxu2 }
 0x378   : > { %v1307_v9 = vpack.i.bf16 %v442_v41, %v440_v38  ;;  %v1192_v38 = vld [vmem:[#allocation9 + $0x8] sm:$0xff] }
 0x379   : > { %988 = vmatpush.bf16.msra.mxu0 %v1192_v38 }
 0x37a   : > { %1308 = vrot.lane.b32.xlu0 %v1307_v9, %s1567_s9  ;;  %v1191_v9 = vld [vmem:[#allocation9] sm:$0xff] }
 0x37d   : > { %989 = vmatpush.bf16.msra.mxu0 %v1191_v9 }
 0x37f   : > { %v596_v10 = vpop.f32.mrf.mxu2 }
 0x387   : > { %v598_v43 = vpop.f32.mrf.mxu2 }
 0x388   : > { %v1292_v45 = vpack.i.bf16 %v598_v43, %v596_v10 }
 0x389   : > { %v672_v47 = vpop.xlane.xlu2 %671 }
 0x38a   : > { %1371 = vrcp.f32 %v672_v47  ;;  %1293 = vrot.lane.b32.xlu1 %v1292_v45, %s1567_s9  ;;  %v1312_v45 = vld [vmem:[%s1993_s3] ss:$0 sm:$0xff] }
 0x390   : > { %v1372_v32 = vpop.eup %1371 }
 0x391   : > { %v676_v23 = vmul.f32 %v1372_v32, %v1358_v22  ;;  %v833_v30 = vpop.xlane.xlu2 %832 }
 0x392   : > { %1373 = vrcp.f32 %v833_v30 }
 0x393   : > { %v677_v36 = vpack.c.bf16 %v676_v23, %v675_v48  ;;  %1375 = vrcp.f32 %v836_v49 }
 0x395   : > { %1153 = vmatmul.msk.bf16.vlgmr.msra.gmra.mxu1 %vm334_vm4, %v677_v36 }
 0x398   : > { %v1374_v53 = vpop.eup %1373 }
 0x399   : > { %v843_v51 = vpop.permute.xlu2 %842  ;;  %v1376_v18 = vpop.eup %1375  ;;  %v839_v55 = vmul.f32 %v1374_v53, %v1360_v39 }
 0x39a   : > { %855 = vmatpush.bf16.msrb.mxu1 %v843_v51  ;;  %v840_v56 = vmul.f32 %v1376_v18, %v1906_v50 }
 0x39c   : > { %v841_v57 = vpack.c.bf16 %v840_v56, %v839_v55 }
 0x3a5   : > { %v760_v58 = vpop.f32.mrf.mxu2  ;;  %1161 = vmatmul.msk.bf16.vlgmr.msrb.gmra.mxu1 %vm334_vm4, %v841_v57 }
 0x3ad   : > { %v762_v44 = vpop.f32.mrf.mxu2 }
 0x3ae   : > { %v1297_v62 = vpack.i.bf16 %v762_v44, %v760_v58 }
 0x3b0   : > { %1298 = vrot.lane.b32.xlu2 %v1297_v62, %s1567_s9 }
 0x3c8   : > { %v924_v60 = vpop.f32.mrf.mxu2 }
 0x3d0   : > { %v926_v54 = vpop.f32.mrf.mxu2 }
 0x3d1   : > { %v1302_v63 = vpack.i.bf16 %v926_v54, %v924_v60 }
 0x3d3   : > { %1303 = vrot.lane.b32.xlu2 %v1302_v63, %s1567_s9 }
 0x3ec   : > { %v1309_v1 = vpop.permute.xlu0 %1308 }
 0x3ed   : > { %v1311_v4 = vunpack.i.h.bf16 %v1309_v1  ;;  %v1310_v40 = vunpack.i.l.bf16 %v1309_v1 }
 0x3ef   : > { %v454_v59 = vsel %vm313_vm2, %v375_v37, %v1311_v4  ;;  %v453_v50 = vsel %vm313_vm2, %v373_v35, %v1310_v40 }
 0x3f0   : > { %v456_v5 = vpack.c.bf16 %v454_v59, %v454_v59  ;;  %v455_v8 = vpack.c.bf16 %v453_v50, %v453_v50 }
 0x3f2   : > { %459 = vst.msk [vmem:[#allocation3 + $0x4] sm:$0xf] %vm457_vm5, %v456_v5 }
 0x3f3   : > { %458 = vst.msk [vmem:[#allocation3] sm:$0xf] %vm457_vm5, %v455_v8 }
 0x3fc   : > { %v1294_v2 = vpop.permute.xlu1 %1293 }
 0x3fd   : > { %v1296_v13 = vunpack.i.h.bf16 %v1294_v2  ;;  %v1295_v46 = vunpack.i.l.bf16 %v1294_v2 }
 0x3ff   : > { %v609_v17 = vsel %vm313_vm2, %v529_v52, %v1295_v46  ;;  %v610_v7 = vsel %vm313_vm2, %v531_v16, %v1296_v13 }
 0x400   : > { %v611_v19 = vpack.c.bf16 %v609_v17, %v609_v17  ;;  %v612_v21 = vpack.c.bf16 %v610_v7, %v610_v7 }
 0x402   : > { %615 = vrot.lane.b32.xlu1 %v611_v19, %s1568_s24  ;;  %617 = vrot.lane.b32.xlu2 %v612_v21, %s1568_s24 }
 0x40a   : > { %v1299_v22 = vpop.permute.xlu2 %1298 }
 0x40b   : > { %v1300_v0 = vunpack.i.l.bf16 %v1299_v22  ;;  %v1301_v25 = vunpack.i.h.bf16 %v1299_v22 }
 0x412   : > { %v693_v61 = vpop.f32.mrf.mxu1 }
 0x413   : > { %v773_v39 = vsel %vm313_vm2, %v693_v61, %v1300_v0 }
 0x414   : > { %v775_v6 = vpack.c.bf16 %v773_v39, %v773_v39 }
 0x416   : > { %779 = vrot.lane.b32.xlu1 %v775_v6, %s1569_s23 }
 0x41a   : > { %v695_v14 = vpop.f32.mrf.mxu1 }
 0x41b   : > { %v774_v15 = vsel %vm313_vm2, %v695_v14, %v1301_v25 }
 0x41c   : > { %v776_v12 = vpack.c.bf16 %v774_v15, %v774_v15 }
 0x41e   : > { %781 = vrot.lane.b32.xlu2 %v776_v12, %s1569_s23 }
 0x422   : > { %v857_v26 = vpop.f32.mrf.mxu1 }
 0x42a   : > { %v859_v31 = vpop.f32.mrf.mxu1 }
 0x42d   : > { %v1304_v27 = vpop.permute.xlu2 %1303 }
 0x42e   : > { %v1306_v28 = vunpack.i.h.bf16 %v1304_v27  ;;  %v1305_v29 = vunpack.i.l.bf16 %v1304_v27 }
 0x430   : > { %v937_v33 = vsel %vm313_vm2, %v857_v26, %v1305_v29  ;;  %v938_v34 = vsel %vm313_vm2, %v859_v31, %v1306_v28 }
 0x431   : > { %v939_v11 = vpack.c.bf16 %v937_v33, %v937_v33  ;;  %v940_v24 = vpack.c.bf16 %v938_v34, %v938_v34 }
 0x433   : > { %943 = vrot.lane.b32.xlu1 %v939_v11, %s1570_s25  ;;  %945 = vrot.lane.b32.xlu0 %v940_v24, %s1570_s25  ;;  %s1487_s25 = scalar_lea.hbm %s1994_s4, 32 }
 0x434   : > { %p1489_p2 = scmp.lt.s32.totalorder %s1487_s25, %s1483_s19 }
 0x436   : > { %p1490_p9 = por %p1489_p2, %p1488_p11 }
 0x438   : > { %p1491_p10 = pnand %p1490_p9, %p1486_p8 }
 0x45c   : > { %v618_v20 = vpop.permute.xlu2 %617 }
 0x45d   : > { %623 = vst.msk [vmem:[#allocation3 + $0x4] sm:$0xf] %vm621_vm6, %v618_v20 }
 0x474   : > { %v616_v35 = vpop.permute.xlu1 %615 }
 0x475   : > { %622 = vst.msk [vmem:[#allocation3] sm:$0xf] %vm621_vm6, %v616_v35 }
 0x478   : > { %v782_v37 = vpop.permute.xlu2 %781 }
 0x479   : > { %787 = vst.msk [vmem:[#allocation3 + $0x4] sm:$0xf] %vm785_vm7, %v782_v37 }
 0x488   : > { %v780_v41 = vpop.permute.xlu1 %779 }
 0x489   : > { %786 = vst.msk [vmem:[#allocation3] sm:$0xf] %vm785_vm7, %v780_v41 }
 0x4a5   : > { %v944_v10 = vpop.permute.xlu1 %943  ;;  %v946_v42 = vpop.permute.xlu0 %945 }
 0x4a6   : > { %950 = vst.msk [vmem:[#allocation3] sm:$0xf] %vm949_vm8, %v944_v10 }
 0x4a7   : > { %951 = vst.msk [vmem:[#allocation3 + $0x4] sm:$0xf] %vm949_vm8, %v946_v42 }
 0x4ae   : > { %v1190_v43 = vld [vmem:[#allocation3] sm:$0xff] }
 0x4af   : > { %1176 = vmatmul.msk.bf16.vlgmr.msra.gmra.mxu0 %vm277_vm0, %v1190_v43 }
 0x52c   : > { %v991_v47 = vpop.f32.mrf.mxu0 }
 0x52d   : > { %v992_v3 = vadd.f32 %v1312_v45, %v991_v47 }
 0x52f   : > { %996 = vst.msk [vmem:[%s250_s12] sm:$0xff] %vm277_vm0, %v992_v3 }
 0x534   : > { %v993_v32 = vpop.f32.mrf.mxu0 }
 0x535   : > { %v994_v48 = vadd.f32 %v1312_v45, %v993_v32 }
 0x537   : > { %997 = vst.msk [vmem:[%s250_s12 + $0x8] sm:$0xff] %vm277_vm0, %v994_v48 }
 0x538   : > { %1494 = shalt.err (!%p1491_p10)
}
 0x539   : > { %s1571_s20 = smov 128  }
 0x53a   : > { %1204 = dma.vmem_to_hbm [thread:$0]  (%p1669_p3), %s1012_s7, 256, %s1014_s30, %s999_s5, %s1571_s20, %s1571_s20, %s1568_s24  }
 0x53b PF: > { %s1028_s29 = sand.u32 1, %s1525_s15   ;;  %p2000_p12 = scmp.ge.s32.totalorder %s1537_s18, 2 }
 0x53c   : > { %s1029_s11 = scalar_lea.sflag [#allocation6], %s1028_s29 }
 0x53d   : > { %p1218_p13 = pnand %p2000_p12, %p1632_p6 }
 0x53f   : > { %p1219_p0 = pneg %p1218_p13 }
 0x541   : > { %1520 = dma.done.wait (%p1219_p0), %s1029_s11, 256  }
 0x542   : > { %1522 = vsyncadd (%p1219_p0), %s1029_s11, 4294967040  ;;  %p18_p5 = scmp.ge.s32.totalorder %s1659_s10, 4   ;;  %s2001_s15 = smov %s1529_s16 }
 0x543   : > { %s2002_s16 = smov %s1533_s17  ;;  %s2003_s17 = smov %s1675_s14 }
 0x544   : > { %s2004_s18 = smov %s1659_s10  ;;  %20 = sbr.rel (!%p18_p5) target bundleno = 6 (0x6), region = 89 }
 0x549   :  { %1035 = vsyncpa [#allocation5], 1 }
 0x54a   :  { %1037 = vsyncpa [#allocation5 + $0x1], 1 }
 0x54b   :  { %1038 = vsyncpa [#allocation8], 1 }
 0x54c   :  { %1039 = vsyncpa [#allocation6], 1 }
 0x54d   :  { %1041 = vsyncpa [#allocation6 + $0x1], 1 }

// kernel: tpu_custom_call.1
= control target key start
LH: loop header
LB: loop body
LE: loop exit
PB: predicated region body
PF: predicated region fallthrough
CT: control target
= control target key end

     0   :  { %9 = vsyncpa [#allocation5], 0  ;;  %s1990_s0 = inlined_call_operand.hbm [shape: bf16[32,32], index: 0, kind: input, shape index: {}]   ;;  %s1991_s1 = inlined_call_operand.hbm [shape: bf16[32,96], index: 1, kind: input, shape index: {}]   ;;  %s1992_s2 = inlined_call_operand.hbm [shape: bf16[32,32], index: 2, kind: input, shape index: {}]   ;;  %s1993_s3 = inlined_call_operand.vmem [shape: f32[1,32], index: 3, kind: input, shape index: {}]   ;;  %s1994_s4 = inlined_call_operand.hbm [shape: f32[32,32], index: 4, kind: output, shape index: {}]  }
   0x1   :  { %11 = vsyncpa [#allocation5 + $0x1], 0 }
   0x2   :  { %12 = vsyncpa [#allocation8], 0 }
   0x3   :  { %13 = vsyncpa [#allocation6], 0 }
   0x4   :  { %15 = vsyncpa [#allocation6 + $0x1], 0  ;;  %s1597_s15 = smov 0   ;;  %s1599_s16 = smov 0  }
   0x5   :  { %s1601_s17 = smov 0   ;;  %s1603_s18 = smov 0  }
   0x6 LB: > { %s1618_s19 = sadd.s32 4294967295, %s1537_s18   ;;  %s1106_s20 = sadd.s32 4294967294, %s1537_s18   ;;  %s1537_s18 = sphi %s1603_s18, %s2004_s18   ;;  %s1533_s17 = sphi %s1601_s17, %s2003_s17   ;;  %s1529_s16 = sphi %s1599_s16, %s2002_s16   ;;  %s1525_s15 = sphi %s1597_s15, %s2001_s15  }
   0x7   : > { %p41_p0 = scmp.ne.s32.totalorder %s1529_s16, %s1525_s15  ;;  %p42_p1 = scmp.eq.s32.totalorder %s1618_s19, 0 }
   0x8   : > { %p128_p2 = scmp.eq.s32.totalorder %s1618_s19, 1  ;;  %p134_p3 = scmp.eq.s32.totalorder %s1106_s20, 1 }
   0x9   : > { %p1627_p4 = por %p42_p1, %p41_p0  ;;  %p1107_p5 = scmp.ge.s32.totalorder %s1537_s18, 1 }
   0xa   : > { %p1632_p6 = por %p134_p3, %p41_p0  ;;  %p141_p7 = scmp.lt.s32.totalorder %s1537_s18, 3 }
   0xb   : > { %s152_s25 = sshll.u32 %s1991_s1, 4  ;;  %s1539_s27 = smov [#allocation7]   ;;  %s153_s25 = int_to_ptr.hbm [resolvable:$true] %s152_s25 }
   0xc   : > { %p1640_p8 = pnand %p1107_p5, %p141_p7  ;;  %s154_s28 = sshll.u32 %s1539_s27, 4  ;;  %s155_s28 = int_to_ptr.vmem [resolvable:$true] %s154_s28 }
   0xd   : > { %s166_s5 = sshll.u32 %s1992_s2, 4  ;;  %s1540_s6 = smov 64   ;;  %s167_s5 = int_to_ptr.hbm [resolvable:$true] %s166_s5 }
   0xe   : > { %p1206_p9 = pneg %p1640_p8  ;;  %s1541_s7 = smov 4  }
   0xf   : > { %s1542_s8 = smov [#allocation9]   ;;  %s1659_s10 = sadd.s32 1, %s1537_s18  }
  0x10   : > { %p1207_p10 = pnand %p1206_p9, %p42_p1  ;;  %s168_s9 = sshll.u32 %s1542_s8, 4  ;;  %s169_s9 = int_to_ptr.vmem [resolvable:$true] %s168_s9 }
  0x11   : > { %s28_s11 = sadd.s32 1, %s1533_s17  ;;  %s25_s12 = ssub.s32 %s1537_s18, %s1659_s10 }
  0x12   : > { %1209 = dma.hbm_to_vmem [thread:$0]  (!%p1207_p10), %s153_s25, 256, %s155_s28, [#allocation8], %s1540_s6, %s1540_s6, %s1541_s7  }
  0x13   : > { %1212 = dma.hbm_to_vmem [thread:$0]  (!%p1207_p10), %s167_s5, 256, %s169_s9, [#allocation8], %s1540_s6, %s1540_s6, %s1541_s7  }
  0x14   : > { %p35_p12 = scmp.ne.s32.totalorder %s1533_s17, %s1529_s16  ;;  %p26_p13 = scmp.eq.s32.totalorder %s25_s12, 0 }
  0x15   : > { %p36_p0 = scmp.eq.s32.totalorder %s1537_s18, 0  ;;  %p1223_p5 = scmp.lt.s32.totalorder %s1537_s18, 2 }
  0x16   : > { %p1669_p3 = por %p128_p2, %p35_p12  ;;  %s185_s20 = sand.u32 1, %s1533_s17  }
  0x17   : > { %s1675_s14 = scalar_select %p26_p13, %s1533_s17, %s28_s11  }
  0x18   : > { %p37_p7 = por %p36_p0, %p35_p12  ;;  %s1111_s23 = sshll.u32 %s185_s20, 3 }
  0x19   : > { %s1182_s24 = sshll.u32 %s1537_s18, 3  ;;  %s189_s29 = scalar_lea.vmem [#allocation4], %s1111_s23 }
  0x1a   : > { %s194_s28 = scalar_lea.hbm %s1990_s0, %s1182_s24  ;;  %s197_s30 = sshll.u32 %s189_s29, 4  ;;  %s198_s30 = int_to_ptr.vmem [resolvable:$true] %s197_s30 }
  0x1b   : > { %s195_s5 = sshll.u32 %s194_s28, 4  ;;  %p1682_p2 = pnand %p1223_p5, %p37_p7  ;;  %s196_s5 = int_to_ptr.hbm [resolvable:$true] %s195_s5 }
  0x1c   : > { %s186_s9 = scalar_lea.sflag [#allocation5], %s185_s20  ;;  %s1437_s11 = sshra.s32 %s196_s5, 4  ;;  %s1438_s11 = int_to_ptr.hbm [resolvable:$true] %s1437_s11 }
  0x1d   : > { %s1439_s12 = scalar_lea.hbm %s1438_s11, 8  ;;  %p1441_p10 = pneg %p1682_p2 }
  0x1e   : > { %p1440_p9 = scmp.ne.s32.totalorder %s1438_s11, %s1439_s12  ;;  %s1444_s25 = scalar_lea.hbm %s1990_s0, 16 }
  0x1f   : > { %p1445_p0 = scmp.lt.s32.totalorder %s1438_s11, %s1990_s0  ;;  %p1446_p5 = scmp.lt.s32.totalorder %s1444_s25, %s1439_s12 }
  0x20   : > { %p1442_p12 = pnand %p1441_p10, %p1440_p9 }
  0x21   : > { %p1447_p7 = por %p1446_p5, %p1445_p0 }
  0x22   : > { %p1443_p13 = pneg %p1442_p12 }
  0x24   : > { %p1448_p11 = pnand %p1447_p7, %p1443_p13 }
  0x26   : > { %1451 = shalt.err (!%p1448_p11)
}
  0x27   : > { %1216 = dma.hbm_to_vmem [thread:$0]  (!%p1682_p2), %s196_s5, 128, %s198_s30, %s186_s9, %s1540_s6, %s1540_s6, %s1541_s7  }
  0x28   : > { %209 = sbr.rel (%p1640_p8) target bundleno = 1339 (0x53b), region = 36  ;;  %s1702_s20 = sand.u32 (!%p1640_p8), 1, %s1529_s16  }
  0x29   : > { %s1115_s29 = sshll.u32 (!%p1640_p8), %s1702_s20, 3  ;;  %s212_s11 = scalar_lea.sflag (!%p1640_p8), [#allocation5], %s1702_s20 }
  0x2a   : > { %s215_s12 = scalar_lea.vmem (!%p1640_p8), [#allocation4], %s1115_s29 }
  0x2d   : > { %1512 = dma.done.wait (%p1627_p4), %s212_s11, 128  }
  0x2e   : > { %1514 = vsyncadd (%p1627_p4), %s212_s11, 4294967168 }
  0x2f   : > { %1516 = dma.done.wait (%p42_p1), [#allocation8], 512  }
  0x30   : > { %1518 = vsyncadd (%p42_p1), [#allocation8], 4294966784  ;;  %v1185_v0 = vld [vmem:[#allocation7 + $0x8] sm:$0xff]  ;;  %v1184_v1 = vld [vmem:[#allocation7] sm:$0xff]  ;;  %vm277_vm0 = vcmask 261120   ;;  %vm297_vm1 = vcmask 781312   ;;  %v300_v36 = vlaneseq }
  0x31   : > { %287 = vmatpush.bf16.msra.mxu0 %v1185_v0  ;;  %v1183_v2 = vld [vmem:[%s215_s12] sm:$0xff]  ;;  %s1543_s21 = smov 116   ;;  %s1544_s26 = smov 124   ;;  %vm313_vm2 = vcmask 31744   ;;  %v1560_v38 = vmov -1e+30  }
  0x32   : > { %s1545_s6 = smov 96   ;;  %s1546_s7 = smov 76   ;;  %v301_v37 = vand.u32 127, %v300_v36  ;;  %vm334_vm4 = vcmask 130048   ;;  %vm457_vm5 = vcmask 60416   ;;  %vm621_vm6 = vcmask 126016  }
  0x33   : > { %s1547_s30 = smov 84   ;;  %s1548_s5 = smov 92   ;;  %vm785_vm7 = vcmask 191616   ;;  %vm949_vm8 = vcmask 257216  }
  0x34   : > { %s1549_s8 = smov 100   ;;  %s1550_s9 = smov 68   ;;  %vm302_vm3 = vcmp.lt.s32.totalorder %v301_v37, 13 }
  0x35   : > { %288 = vmatpush.bf16.msra.mxu0 %v1184_v1  ;;  %s1551_s24 = smov 108   ;;  %s1552_s23 = smov 80   ;;  %v1749_v39 = vsel %vm302_vm3, 0.0, %v1560_v38 }
  0x36   : > { %s1553_s25 = smov 120   ;;  %s1554_s27 = smov 88  }
  0x37   : > { %s1555_s28 = smov 104   ;;  %s1556_s29 = smov 72  }
  0x38   : > { %1131 = vmatmul.msk.bf16.vlgmr.msra.gmra.mxu0 %vm277_vm0, %v1183_v2  ;;  %s1557_s11 = smov 112   ;;  %s1558_s12 = smov 60  }
  0xb5   : > { %v290_v3 = vpop.f32.mrf.mxu0 }
  0xb6   : > { %v295_v4 = vpack.c.bf16 %v290_v3, %v290_v3 }
  0xb8   : > { %298 = vst.msk [vmem:[#allocation2] sm:$0xf] %vm297_vm1, %v295_v4 }
  0xbd   : > { %v292_v5 = vpop.f32.mrf.mxu0 }
  0xbe   : > { %v296_v6 = vpack.c.bf16 %v292_v5, %v292_v5 }
  0xc0   : > { %299 = vst.msk [vmem:[#allocation2 + $0x4] sm:$0xf] %vm297_vm1, %v296_v6 }
  0xc7   : > { %v1715_v7 = vld [vmem:[#allocation2] sm:$0xff] }
  0xc8   : > { %v1186_v8 = vld [vmem:[#allocation2] sm:$0xff]  ;;  %534 = vrot.lane.b32.xlu2 %v1715_v7, %s1543_s21  ;;  %s1559_s21 = smov 64  }
  0xc9   : > { %378 = vrot.lane.b32.xlu1 %v1186_v8, %s1544_s26  ;;  %311 = vrot.lane.b32.xlu0 %v1186_v8, %s1545_s6  ;;  %v1718_v9 = vld [vmem:[#allocation2] sm:$0xff]  ;;  %s1561_s26 = smov 52   ;;  %s1562_s6 = smov 56  }
  0xca   : > { %v1722_v10 = vld [vmem:[#allocation2] sm:$0xff] }
  0xd0   : > { %700 = vrot.lane.b32.xlu2 %v1718_v9, %s1546_s7  ;;  %s1563_s7 = smov 44  }
  0xd1   : > { %536 = vrot.lane.b32.xlu1 %v1715_v7, %s1547_s30  ;;  %380 = vrot.lane.b32.xlu0 %v1186_v8, %s1548_s5  ;;  %s1564_s30 = smov 36   ;;  %s1565_s5 = smov 48  }
  0xd8   : > { %862 = vrot.lane.b32.xlu2 %v1722_v10, %s1549_s8  ;;  %s1566_s8 = smov 40  }
  0xd9   : > { %864 = vrot.lane.b32.xlu1 %v1722_v10, %s1550_s9  ;;  %698 = vrot.lane.b32.xlu0 %v1718_v9, %s1551_s24  ;;  %s1567_s9 = smov 4   ;;  %s1568_s24 = smov 8  }
  0xe0   : > { %633 = vrot.lane.b32.xlu2 %v1718_v9, %s1552_s23  ;;  %s1569_s23 = smov 16  }
  0xe1   : > { %467 = vrot.lane.b32.xlu1 %v1715_v7, %s1553_s25  ;;  %469 = vrot.lane.b32.xlu0 %v1715_v7, %s1554_s27  ;;  %s1570_s25 = smov 24   ;;  %s1118_s27 = sshll.u32 %s1702_s20, 4 }
  0xe8   : > { %795 = vrot.lane.b32.xlu2 %v1722_v10, %s1555_s28 }
  0xe9   : > { %797 = vrot.lane.b32.xlu1 %v1722_v10, %s1556_s29  ;;  %631 = vrot.lane.b32.xlu0 %v1718_v9, %s1557_s11  ;;  %s1193_s11 = sshll.u32 %s1618_s19, 4 }
  0xf1   : > { %425 = vrot.lane.b32.xlu1 %v1186_v8, %s1558_s12  ;;  %358 = vrot.lane.b32.xlu0 %v1186_v8, %s1559_s21  ;;  %s250_s12 = scalar_lea.vmem [#allocation10], %s1118_s27 }
 0x122   : > { %v535_v11 = vpop.permute.xlu2 %534 }
 0x12a   : > { %v701_v15 = vpop.permute.xlu2 %700 }
 0x12b   : > { %v706_v23 = vsel %vm313_vm2, %v701_v15, 0 }
 0x132   : > { %v863_v20 = vpop.permute.xlu2 %862 }
 0x13a   : > { %v634_v24 = vpop.permute.xlu2 %633 }
 0x13b   : > { %v379_v12 = vpop.permute.xlu1 %378  ;;  %v312_v13 = vpop.permute.xlu0 %311  ;;  %v639_v28 = vsel %vm313_vm2, %v634_v24, 0 }
 0x13c   : > { %v318_v14 = vsel %vm313_vm2, %v312_v13, 0 }
 0x13d   : > { %327 = vmatpush.bf16.xpose.msra.mxu1 %v318_v14 }
 0x142   : > { %v796_v35 = vpop.permute.xlu2 %795 }
 0x143   : > { %v537_v16 = vpop.permute.xlu1 %536  ;;  %v381_v17 = vpop.permute.xlu0 %380 }
 0x144   : > { %v542_v18 = vsel %vm313_vm2, %v537_v16, 0  ;;  %1136 = vmatmul.msk.bf16.vlgmr.msra.gmra.mxu1 %vm313_vm2, %v1186_v8  ;;  %v386_v19 = vsel %vm313_vm2, %v381_v17, 0 }
 0x145   : > { %395 = vmatpush.bf16.xpose.msra.mxu3 %v386_v19 }
 0x14b   : > { %v865_v21 = vpop.permute.xlu1 %864  ;;  %v699_v22 = vpop.permute.xlu0 %698 }
 0x14c   : > { %1138 = vmatmul.msk.bf16.vlgmr.msra.gmra.mxu3 %vm313_vm2, %v379_v12  ;;  %v870_v32 = vsel %vm313_vm2, %v865_v21, 0 }
 0x14d   : > { %551 = vmatpush.bf16.xpose.msrb.mxu3 %v542_v18 }
 0x153   : > { %v468_v25 = vpop.permute.xlu1 %467  ;;  %v470_v26 = vpop.permute.xlu0 %469 }
 0x154   : > { %v475_v27 = vsel %vm313_vm2, %v470_v26, 0 }
 0x155   : > { %715 = vmatpush.bf16.xpose.msra.mxu3 %v706_v23  ;;  %484 = vmatpush.bf16.xpose.msrb.mxu0 %v475_v27 }
 0x15b   : > { %v798_v29 = vpop.permute.xlu1 %797  ;;  %v632_v31 = vpop.permute.xlu0 %631 }
 0x15c   : > { %v803_v30 = vsel %vm313_vm2, %v798_v29, 0  ;;  %1144 = vmatmul.msk.bf16.vlgmr.msrb.gmra.mxu0 %vm313_vm2, %v468_v25  ;;  %1146 = vmatmul.msk.bf16.vlgmr.msrb.gmra.mxu3 %vm313_vm2, %v535_v11 }
 0x15d   : > { %648 = vmatpush.bf16.xpose.msra.mxu0 %v639_v28  ;;  %879 = vmatpush.bf16.xpose.msrb.mxu3 %v870_v32 }
 0x163   : > { %v426_v33 = vpop.permute.xlu1 %425  ;;  %v359_v34 = vpop.permute.xlu0 %358 }
 0x164   : > { %371 = vmatpush.bf16.msra.mxu2 %v359_v34 }
 0x165   : > { %812 = vmatpush.bf16.xpose.msrb.mxu0 %v803_v30 }
 0x168   : > { %438 = vmatpush.bf16.msrb.mxu2 %v426_v33 }
 0x16c   : > { %1152 = vmatmul.msk.bf16.vlgmr.msra.gmra.mxu0 %vm313_vm2, %v632_v31  ;;  %1154 = vmatmul.msk.bf16.vlgmr.msra.gmra.mxu3 %vm313_vm2, %v699_v22 }
 0x17c   : > { %1160 = vmatmul.msk.bf16.vlgmr.msrb.gmra.mxu0 %vm313_vm2, %v796_v35  ;;  %1162 = vmatmul.msk.bf16.vlgmr.msrb.gmra.mxu3 %vm313_vm2, %v863_v20 }
 0x1c1   : > { %v329_v40 = vpop.f32.mrf.mxu1 }
 0x1c2   : > { %v330_v41 = vadd.f32 %v329_v40, %v1749_v39 }
 0x1c4   : > { %v335_v42 = vsel %vm334_vm4, %v330_v41, -inf }
 0x1c5   : > { %336 = vmax.xlane.f32.xlu0 %v335_v42 }
 0x1c9   : > { %v331_v43 = vpop.f32.mrf.mxu1 }
 0x1ca   : > { %v1754_v44 = vadd.f32 %v331_v43, %v1749_v39 }
 0x1cc   : > { %v338_v45 = vsel %vm334_vm4, %v1754_v44, -inf }
 0x1cd   : > { %339 = vmax.xlane.f32.xlu1 %v338_v45 }
 0x1cf   : > { %v397_v46 = vpop.f32.mrf.mxu3 }
 0x1d0   : > { %v1759_v47 = vadd.f32 %v397_v46, %v1749_v39 }
 0x1d2   : > { %v402_v48 = vsel %vm334_vm4, %v1759_v47, -inf }
 0x1d3   : > { %403 = vmax.xlane.f32.xlu2 %v402_v48 }
 0x1d7   : > { %v399_v49 = vpop.f32.mrf.mxu3 }
 0x1d8   : > { %v1779_v60 = vadd.f32 %v399_v49, %v1749_v39 }
 0x1d9   : > { %v486_v50 = vpop.f32.mrf.mxu0 }
 0x1da   : > { %v1764_v51 = vadd.f32 %v486_v50, %v1749_v39  ;;  %v405_v0 = vsel %vm334_vm4, %v1779_v60, -inf }
 0x1dc   : > { %v491_v52 = vsel %vm334_vm4, %v1764_v51, -inf }
 0x1dd   : > { %492 = vmax.xlane.f32.xlu0 %v491_v52 }
 0x1df   : > { %v553_v53 = vpop.f32.mrf.mxu3 }
 0x1e0   : > { %v1769_v54 = vadd.f32 %v553_v53, %v1749_v39 }
 0x1e1   : > { %v488_v55 = vpop.f32.mrf.mxu0 }
 0x1e2   : > { %v1772_v56 = vadd.f32 %v488_v55, %v1749_v39  ;;  %v558_v58 = vsel %vm334_vm4, %v1769_v54, -inf }
 0x1e4   : > { %v494_v57 = vsel %vm334_vm4, %v1772_v56, -inf }
 0x1e5   : > { %495 = vmax.xlane.f32.xlu2 %v494_v57  ;;  %559 = vmax.xlane.f32.xlu0 %v558_v58 }
 0x1e7   : > { %v555_v59 = vpop.f32.mrf.mxu3 }
 0x1e8   : > { %v1782_v61 = vadd.f32 %v555_v59, %v1749_v39 }
 0x1e9   : > { %v650_v62 = vpop.f32.mrf.mxu0 }
 0x1ea   : > { %v561_v63 = vsel %vm334_vm4, %v1782_v61, -inf  ;;  %v1821_v23 = vadd.f32 %v650_v62, %v1749_v39 }
 0x1eb   : > { %562 = vmax.xlane.f32.xlu1 %v561_v63 }
 0x1ec   : > { %v655_v24 = vsel %vm334_vm4, %v1821_v23, -inf }
 0x1ed   : > { %406 = vmax.xlane.f32.xlu2 %v405_v0 }
 0x1ef   : > { %v717_v1 = vpop.f32.mrf.mxu3 }
 0x1f0   : > { %v1789_v2 = vadd.f32 %v717_v1, %v1749_v39 }
 0x1f1   : > { %v1791_v3 = vpop.f32.mrf.mxu0 }
 0x1f2   : > { %v722_v4 = vsel %vm334_vm4, %v1789_v2, -inf }
 0x1f5   : > { %723 = vmax.xlane.f32.xlu2 %v722_v4 }
 0x1f7   : > { %v719_v5 = vpop.f32.mrf.mxu3 }
 0x1f8   : > { %v1796_v6 = vadd.f32 %v719_v5, %v1749_v39 }
 0x1f9   : > { %v814_v8 = vpop.f32.mrf.mxu0 }
 0x1fa   : > { %v725_v11 = vsel %vm334_vm4, %v1796_v6, -inf  ;;  %v1801_v12 = vadd.f32 %v814_v8, %v1749_v39 }
 0x1fb   : > { %726 = vmax.xlane.f32.xlu0 %v725_v11 }
 0x1fc   : > { %v819_v16 = vsel %vm334_vm4, %v1801_v12, -inf }
 0x1ff   : > { %v881_v13 = vpop.f32.mrf.mxu3 }
 0x200   : > { %v1804_v14 = vadd.f32 %v881_v13, %v1749_v39 }
 0x201   : > { %v816_v17 = vpop.f32.mrf.mxu0 }
 0x202   : > { %v886_v15 = vsel %vm334_vm4, %v1804_v14, -inf  ;;  %v1811_v18 = vadd.f32 %v816_v17, %v1749_v39 }
 0x203   : > { %887 = vmax.xlane.f32.xlu1 %v886_v15  ;;  %820 = vmax.xlane.f32.xlu0 %v819_v16  ;;  %v1873_v15 = vadd.f32 %v1791_v3, %v1749_v39 }
 0x204   : > { %v822_v22 = vsel %vm334_vm4, %v1811_v18, -inf }
 0x207   : > { %v883_v19 = vpop.f32.mrf.mxu3 }
 0x208   : > { %v1814_v20 = vadd.f32 %v883_v19, %v1749_v39 }
 0x20a   : > { %v889_v21 = vsel %vm334_vm4, %v1814_v20, -inf }
 0x20b   : > { %890 = vmax.xlane.f32.xlu2 %v889_v21  ;;  %823 = vmax.xlane.f32.xlu0 %v822_v22 }
 0x213   : > { %656 = vmax.xlane.f32.xlu2 %v655_v24 }
 0x238   : > { %v337_v25 = vpop.xlane.xlu0 %336 }
 0x239   : > { %v341_v26 = vsub.f32 %v330_v41, %v337_v25 }
 0x23b   : > { %v343_v27 = vmul.f32 1.442695, %v341_v26 }
 0x23d   : > { %1313 = vpow2.f32 %v343_v27 }
 0x240   : > { %v340_v28 = vpop.xlane.xlu1 %339 }
 0x241   : > { %v342_v29 = vsub.f32 %v1754_v44, %v340_v28 }
 0x243   : > { %v1826_v30 = vpop.eup %1313  ;;  %v345_v31 = vmul.f32 1.442695, %v342_v29 }
 0x244   : > { %v347_v32 = vsel %vm334_vm4, %v1826_v30, 0.0 }
 0x245   : > { %1315 = vpow2.f32 %v345_v31  ;;  %348 = vadd.xlane.f32.xlu1 %v347_v32 }
 0x246   : > { %v404_v33 = vpop.xlane.xlu2 %403 }
 0x247   : > { %v408_v34 = vsub.f32 %v1759_v47, %v404_v33 }
 0x249   : > { %v410_v35 = vmul.f32 1.442695, %v408_v34 }
 0x24b   : > { %v1831_v36 = vpop.eup %1315  ;;  %1317 = vpow2.f32 %v410_v35 }
 0x24c   : > { %v350_v37 = vsel %vm334_vm4, %v1831_v36, 0.0 }
 0x24d   : > { %351 = vadd.xlane.f32.xlu2 %v350_v37 }
 0x250   : > { %v493_v38 = vpop.xlane.xlu0 %492 }
 0x251   : > { %v1835_v40 = vpop.eup %1317  ;;  %v497_v41 = vsub.f32 %v1764_v51, %v493_v38 }
 0x252   : > { %v414_v42 = vsel %vm334_vm4, %v1835_v40, 0.0 }
 0x253   : > { %v499_v43 = vmul.f32 1.442695, %v497_v41  ;;  %415 = vadd.xlane.f32.xlu1 %v414_v42 }
 0x255   : > { %1319 = vpow2.f32 %v499_v43 }
 0x258   : > { %v496_v44 = vpop.xlane.xlu2 %495  ;;  %v560_v49 = vpop.xlane.xlu0 %559 }
 0x259   : > { %v498_v45 = vsub.f32 %v1772_v56, %v496_v44  ;;  %v564_v53 = vsub.f32 %v1769_v54, %v560_v49 }
 0x25b   : > { %v1841_v46 = vpop.eup %1319  ;;  %v501_v47 = vmul.f32 1.442695, %v498_v45  ;;  %v566_v57 = vmul.f32 1.442695, %v564_v53 }
 0x25c   : > { %v503_v48 = vsel %vm334_vm4, %v1841_v46, 0.0 }
 0x25d   : > { %1321 = vpow2.f32 %v501_v47  ;;  %504 = vadd.xlane.f32.xlu0 %v503_v48 }
 0x25e   : > { %v563_v58 = vpop.xlane.xlu1 %562 }
 0x25f   : > { %v565_v62 = vsub.f32 %v1782_v61, %v563_v58 }
 0x260   : > { %v407_v50 = vpop.xlane.xlu2 %406 }
 0x261   : > { %v409_v51 = vsub.f32 %v1779_v60, %v407_v50  ;;  %v568_v54 = vmul.f32 1.442695, %v565_v62 }
 0x263   : > { %v1846_v52 = vpop.eup %1321  ;;  %v412_v55 = vmul.f32 1.442695, %v409_v51 }
 0x264   : > { %v506_v56 = vsel %vm334_vm4, %v1846_v52, 0.0 }
 0x265   : > { %1323 = vpow2.f32 %v412_v55  ;;  %507 = vadd.xlane.f32.xlu0 %v506_v56 }
 0x266   : > { %1325 = vpow2.f32 %v566_v57 }
 0x267   : > { %1327 = vpow2.f32 %v568_v54 }
 0x268   : > { %v724_v63 = vpop.xlane.xlu2 %723 }
 0x269   : > { %v728_v1 = vsub.f32 %v1789_v2, %v724_v63 }
 0x26b   : > { %v1851_v59 = vpop.eup %1323  ;;  %v730_v5 = vmul.f32 1.442695, %v728_v1 }
 0x26c   : > { %581 = vrot.lane.b32.xlu1 %v1715_v7, %s1561_s26  ;;  %v417_v60 = vsel %vm334_vm4, %v1851_v59, 0.0  ;;  %v1857_v0 = vpop.eup %1325 }
 0x26d   : > { %418 = vadd.xlane.f32.xlu2 %v417_v60  ;;  %v570_v4 = vsel %vm334_vm4, %v1857_v0, 0.0  ;;  %v1862_v61 = vpop.eup %1327  ;;  %1329 = vpow2.f32 %v730_v5 }
 0x26e   : > { %v573_v8 = vsel %vm334_vm4, %v1862_v61, 0.0  ;;  %v727_v13 = vpop.xlane.xlu0 %726 }
 0x26f   : > { %v729_v16 = vsub.f32 %v1796_v6, %v727_v13 }
 0x271   : > { %v732_v17 = vmul.f32 1.442695, %v729_v16 }
 0x273   : > { %v1867_v11 = vpop.eup %1329  ;;  %1331 = vpow2.f32 %v732_v17 }
 0x274   : > { %v734_v2 = vsel %vm334_vm4, %v1867_v11, 0.0 }
 0x275   : > { %571 = vadd.xlane.f32.xlu2 %v570_v4 }
 0x276   : > { %v888_v19 = vpop.xlane.xlu1 %887  ;;  %v1891_v31 = vpop.xlane.xlu0 %820 }
 0x277   : > { %v892_v21 = vsub.f32 %v1804_v14, %v888_v19 }
 0x279   : > { %514 = vrot.lane.b32.xlu0 %v1715_v7, %s1562_s6  ;;  %v658_v7 = vsel %vm334_vm4, %v1873_v15, -inf  ;;  %v894_v22 = vmul.f32 1.442695, %v892_v21  ;;  %v1880_v24 = vpop.eup %1331  ;;  %s1010_s6 = scalar_lea.hbm %s1994_s4, %s1193_s11 }
 0x27a   : > { %v737_v39 = vsel %vm334_vm4, %v1880_v24, 0.0 }
 0x27b   : > { %1333 = vpow2.f32 %v894_v22 }
 0x27d   : > { %574 = vadd.xlane.f32.xlu2 %v573_v8 }
 0x27e   : > { %v891_v25 = vpop.xlane.xlu2 %890 }
 0x27f   : > { %v893_v14 = vsub.f32 %v1814_v20, %v891_v25 }
 0x281   : > { %v1884_v3 = vpop.eup %1333  ;;  %v896_v26 = vmul.f32 1.442695, %v893_v14 }
 0x282   : > { %v898_v6 = vsel %vm334_vm4, %v1884_v3, 0.0 }
 0x283   : > { %1335 = vpow2.f32 %v896_v26 }
 0x285   : > { %735 = vadd.xlane.f32.xlu2 %v734_v2 }
 0x286   : > { %v657_v27 = vpop.xlane.xlu2 %656 }
 0x287   : > { %v661_v35 = vsub.f32 %v1821_v23, %v657_v27 }
 0x289   : > { %v1893_v32 = vpop.eup %1335  ;;  %v663_v42 = vmul.f32 1.442695, %v661_v35 }
 0x28a   : > { %v901_v34 = vsel %vm334_vm4, %v1893_v32, 0.0 }
 0x296   : > { %659 = vmax.xlane.f32.xlu1 %v658_v7  ;;  %v825_v7 = vsub.f32 %v1801_v12, %v1891_v31 }
 0x298   : > { %v827_v21 = vmul.f32 1.442695, %v825_v7 }
 0x29d   : > { %745 = vrot.lane.b32.xlu2 %v1718_v9, %s1563_s7  ;;  %s1011_s7 = sshll.u32 %s250_s12, 4  ;;  %s1012_s7 = int_to_ptr.vmem [resolvable:$true] %s1011_s7 }
 0x2a3   : > { %738 = vadd.xlane.f32.xlu0 %v737_v39 }
 0x2ab   : > { %899 = vadd.xlane.f32.xlu0 %v898_v6 }
 0x2af   : > { %909 = vrot.lane.b32.xlu1 %v1722_v10, %s1564_s30  ;;  %s1013_s30 = sshll.u32 %s1010_s6, 4  ;;  %s1014_s30 = int_to_ptr.hbm [resolvable:$true] %s1013_s30 }
 0x2b8   : > { %v349_v28 = vpop.xlane.xlu1 %348 }
 0x2b9   : > { %1337 = vrcp.f32 %v349_v28 }
 0x2bf   : > { %678 = vrot.lane.b32.xlu0 %v1718_v9, %s1565_s5  ;;  %v1338_v33 = vpop.eup %1337  ;;  %v824_v9 = vpop.xlane.xlu0 %823  ;;  %s999_s5 = scalar_lea.sflag [#allocation6], %s1702_s20 }
 0x2c0   : > { %v352_v29 = vpop.xlane.xlu2 %351  ;;  %v355_v37 = vmul.f32 %v1338_v33, %v1826_v30  ;;  %v826_v45 = vsub.f32 %v1811_v18, %v824_v9 }
 0x2c1   : > { %1339 = vrcp.f32 %v352_v29 }
 0x2c2   : > { %1341 = vpow2.f32 %v663_v42  ;;  %v829_v23 = vmul.f32 1.442695, %v826_v45 }
 0x2c4   : > { %1343 = vpow2.f32 %v829_v23 }
 0x2c6   : > { %902 = vadd.xlane.f32.xlu2 %v901_v34  ;;  %v416_v47 = vpop.xlane.xlu1 %415 }
 0x2c7   : > { %v1340_v20 = vpop.eup %1339  ;;  %1345 = vrcp.f32 %v416_v47 }
 0x2c8   : > { %v356_v38 = vmul.f32 %v1340_v20, %v1831_v36  ;;  %v1901_v44 = vpop.eup %1341 }
 0x2c9   : > { %v667_v48 = vsel %vm334_vm4, %v1901_v44, 0.0 }
 0x2ca   : > { %v357_v41 = vpack.c.bf16 %v356_v38, %v355_v37  ;;  %v1906_v50 = vpop.eup %1343 }
 0x2cb   : > { %v834_v62 = vsel %vm334_vm4, %v1906_v50, 0.0 }
 0x2cc   : > { %1137 = vmatmul.msk.bf16.vlgmr.msra.gmra.mxu2 %vm334_vm4, %v357_v41 }
 0x2cd   : > { %v1346_v51 = vpop.eup %1345 }
 0x2ce   : > { %v422_v56 = vmul.f32 %v1346_v51, %v1835_v40 }
 0x2d0   : > { %v505_v43 = vpop.xlane.xlu0 %504 }
 0x2d8   : > { %v508_v30 = vpop.xlane.xlu0 %507 }
 0x2d9   : > { %668 = vadd.xlane.f32.xlu1 %v667_v48  ;;  %1347 = vrcp.f32 %v508_v30 }
 0x2de   : > { %v582_v36 = vpop.permute.xlu1 %581 }
 0x2df   : > { %594 = vmatpush.bf16.msra.mxu2 %v582_v36  ;;  %v1348_v53 = vpop.eup %1347 }
 0x2e0   : > { %v419_v49 = vpop.xlane.xlu2 %418  ;;  %v512_v60 = vmul.f32 %v1348_v53, %v1846_v52 }
 0x2e1   : > { %1349 = vrcp.f32 %v419_v49 }
 0x2e2   : > { %1351 = vrcp.f32 %v505_v43 }
 0x2e7   : > { %v1350_v18 = vpop.eup %1349 }
 0x2e8   : > { %v1352_v55 = vpop.eup %1351  ;;  %v423_v57 = vmul.f32 %v1350_v18, %v1851_v59  ;;  %v572_v58 = vpop.xlane.xlu2 %571 }
 0x2e9   : > { %835 = vadd.xlane.f32.xlu0 %v834_v62  ;;  %v511_v63 = vmul.f32 %v1352_v55, %v1841_v46  ;;  %1353 = vrcp.f32 %v572_v58 }
 0x2ea   : > { %v424_v54 = vpack.c.bf16 %v423_v57, %v422_v56 }
 0x2eb   : > { %v515_v1 = vpop.permute.xlu0 %514  ;;  %v513_v4 = vpack.c.bf16 %v512_v60, %v511_v63 }
 0x2ec   : > { %1139 = vmatmul.msk.bf16.vlgmr.msrb.gmra.mxu2 %vm334_vm4, %v424_v54  ;;  %527 = vmatpush.bf16.msrb.mxu1 %v515_v1 }
 0x2ef   : > { %1145 = vmatmul.msk.bf16.vlgmr.msrb.gmra.mxu1 %vm334_vm4, %v513_v4  ;;  %v1354_v59 = vpop.eup %1353 }
 0x2f0   : > { %v575_v40 = vpop.xlane.xlu2 %574  ;;  %v578_v8 = vmul.f32 %v1354_v59, %v1857_v0 }
 0x2f1   : > { %1355 = vrcp.f32 %v575_v40 }
 0x2f7   : > { %v1356_v5 = vpop.eup %1355 }
 0x2f8   : > { %v579_v52 = vmul.f32 %v1356_v5, %v1862_v61  ;;  %v736_v2 = vpop.xlane.xlu2 %735 }
 0x2fa   : > { %v580_v13 = vpack.c.bf16 %v579_v52, %v578_v8 }
 0x2fc   : > { %1147 = vmatmul.msk.bf16.vlgmr.msra.gmra.mxu2 %vm334_vm4, %v580_v13 }
 0x300   : > { %v746_v46 = vpop.permute.xlu2 %745 }
 0x301   : > { %758 = vmatpush.bf16.msrb.mxu2 %v746_v46 }
 0x309   : > { %v660_v16 = vpop.xlane.xlu1 %659 }
 0x30a   : > { %v662_v17 = vsub.f32 %v1873_v15, %v660_v16 }
 0x30c   : > { %v665_v19 = vmul.f32 1.442695, %v662_v17 }
 0x30e   : > { %1357 = vpow2.f32 %v665_v19 }
 0x30f   : > { %1359 = vpow2.f32 %v827_v21 }
 0x310   : > { %1361 = vrcp.f32 %v736_v2 }
 0x314   : > { %v1358_v22 = vpop.eup %1357 }
 0x315   : > { %v670_v0 = vsel %vm334_vm4, %v1358_v22, 0.0  ;;  %v1360_v39 = vpop.eup %1359 }
 0x316   : > { %671 = vadd.xlane.f32.xlu2 %v670_v0  ;;  %v739_v61 = vpop.xlane.xlu0 %738  ;;  %v1362_v6 = vpop.eup %1361  ;;  %v831_v14 = vsel %vm334_vm4, %v1360_v39, 0.0 }
 0x317   : > { %1363 = vrcp.f32 %v739_v61  ;;  %v742_v15 = vmul.f32 %v1362_v6, %v1867_v11 }
 0x31d   : > { %v1364_v25 = vpop.eup %1363 }
 0x31e   : > { %v743_v12 = vmul.f32 %v1364_v25, %v1880_v24  ;;  %832 = vadd.xlane.f32.xlu2 %v831_v14  ;;  %v900_v28 = vpop.xlane.xlu0 %899 }
 0x31f   : > { %1365 = vrcp.f32 %v900_v28 }
 0x320   : > { %v744_v26 = vpack.c.bf16 %v743_v12, %v742_v15 }
 0x321   : > { %v910_v27 = vpop.permute.xlu1 %909 }
 0x322   : > { %1155 = vmatmul.msk.bf16.vlgmr.msrb.gmra.mxu2 %vm334_vm4, %v744_v26 }
 0x323   : > { %922 = vmatpush.bf16.msra.mxu2 %v910_v27 }
 0x325   : > { %v1366_v33 = vpop.eup %1365 }
 0x326   : > { %v906_v11 = vmul.f32 %v1366_v33, %v1884_v3 }
 0x331   : > { %v679_v29 = vpop.permute.xlu0 %678 }
 0x332   : > { %691 = vmatpush.bf16.msra.mxu1 %v679_v29 }
 0x336   : > { %842 = vrot.lane.b32.xlu2 %v1722_v10, %s1566_s8  ;;  %s1481_s8 = sshra.s32 %s1014_s30, 4  ;;  %s1482_s8 = int_to_ptr.hbm [resolvable:$true] %s1481_s8 }
 0x337   : > { %s1483_s19 = scalar_lea.hbm %s1482_s8, 16  ;;  %p1488_p11 = scmp.lt.s32.totalorder %s1482_s8, %s1994_s4 }
 0x338   : > { %p1484_p1 = scmp.ne.s32.totalorder %s1482_s8, %s1483_s19 }
 0x339   : > { %v903_v31 = vpop.xlane.xlu2 %902 }
 0x33a   : > { %1367 = vrcp.f32 %v903_v31  ;;  %p1485_p4 = pnand %p1484_p1, %p1669_p3 }
 0x33c   : > { %p1486_p8 = pneg %p1485_p4 }
 0x340   : > { %v1368_v34 = vpop.eup %1367 }
 0x341   : > { %v907_v24 = vmul.f32 %v1368_v34, %v1893_v32 }
 0x343   : > { %v908_v20 = vpack.c.bf16 %v907_v24, %v906_v11 }
 0x345   : > { %1163 = vmatmul.msk.bf16.vlgmr.msra.gmra.mxu2 %vm334_vm4, %v908_v20 }
 0x34c   : > { %v669_v42 = vpop.xlane.xlu1 %668 }
 0x34d   : > { %1369 = vrcp.f32 %v669_v42 }
 0x34f   : > { %v373_v35 = vpop.f32.mrf.mxu2 }
 0x353   : > { %v1370_v3 = vpop.eup %1369 }
 0x354   : > { %v675_v48 = vmul.f32 %v1370_v3, %v1901_v44 }
 0x357   : > { %v375_v37 = vpop.f32.mrf.mxu2 }
 0x35c   : > { %v836_v49 = vpop.xlane.xlu0 %835 }
 0x36c   : > { %v529_v52 = vpop.f32.mrf.mxu1 }
 0x36f   : > { %v440_v38 = vpop.f32.mrf.mxu2 }
 0x374   : > { %v531_v16 = vpop.f32.mrf.mxu1 }
 0x377   : > { %v442_v41 = vpop.f32.mrf.mxu2 }
 0x378   : > { %v1307_v9 = vpack.i.bf16 %v442_v41, %v440_v38  ;;  %v1192_v38 = vld [vmem:[#allocation9 + $0x8] sm:$0xff] }
 0x379   : > { %988 = vmatpush.bf16.msra.mxu0 %v1192_v38 }
 0x37a   : > { %1308 = vrot.lane.b32.xlu0 %v1307_v9, %s1567_s9  ;;  %v1191_v9 = vld [vmem:[#allocation9] sm:$0xff] }
 0x37d   : > { %989 = vmatpush.bf16.msra.mxu0 %v1191_v9 }
 0x37f   : > { %v596_v10 = vpop.f32.mrf.mxu2 }
 0x387   : > { %v598_v43 = vpop.f32.mrf.mxu2 }
 0x388   : > { %v1292_v45 = vpack.i.bf16 %v598_v43, %v596_v10 }
 0x389   : > { %v672_v47 = vpop.xlane.xlu2 %671 }
 0x38a   : > { %1371 = vrcp.f32 %v672_v47  ;;  %1293 = vrot.lane.b32.xlu1 %v1292_v45, %s1567_s9  ;;  %v1312_v45 = vld [vmem:[%s1993_s3] ss:$0 sm:$0xff] }
 0x390   : > { %v1372_v32 = vpop.eup %1371 }
 0x391   : > { %v676_v23 = vmul.f32 %v1372_v32, %v1358_v22  ;;  %v833_v30 = vpop.xlane.xlu2 %832 }
 0x392   : > { %1373 = vrcp.f32 %v833_v30 }
 0x393   : > { %v677_v36 = vpack.c.bf16 %v676_v23, %v675_v48  ;;  %1375 = vrcp.f32 %v836_v49 }
 0x395   : > { %1153 = vmatmul.msk.bf16.vlgmr.msra.gmra.mxu1 %vm334_vm4, %v677_v36 }
 0x398   : > { %v1374_v53 = vpop.eup %1373 }
 0x399   : > { %v843_v51 = vpop.permute.xlu2 %842  ;;  %v1376_v18 = vpop.eup %1375  ;;  %v839_v55 = vmul.f32 %v1374_v53, %v1360_v39 }
 0x39a   : > { %855 = vmatpush.bf16.msrb.mxu1 %v843_v51  ;;  %v840_v56 = vmul.f32 %v1376_v18, %v1906_v50 }
 0x39c   : > { %v841_v57 = vpack.c.bf16 %v840_v56, %v839_v55 }
 0x3a5   : > { %v760_v58 = vpop.f32.mrf.mxu2  ;;  %1161 = vmatmul.msk.bf16.vlgmr.msrb.gmra.mxu1 %vm334_vm4, %v841_v57 }
 0x3ad   : > { %v762_v44 = vpop.f32.mrf.mxu2 }
 0x3ae   : > { %v1297_v62 = vpack.i.bf16 %v762_v44, %v760_v58 }
 0x3b0   : > { %1298 = vrot.lane.b32.xlu2 %v1297_v62, %s1567_s9 }
 0x3c8   : > { %v924_v60 = vpop.f32.mrf.mxu2 }
 0x3d0   : > { %v926_v54 = vpop.f32.mrf.mxu2 }
 0x3d1   : > { %v1302_v63 = vpack.i.bf16 %v926_v54, %v924_v60 }
 0x3d3   : > { %1303 = vrot.lane.b32.xlu2 %v1302_v63, %s1567_s9 }
 0x3ec   : > { %v1309_v1 = vpop.permute.xlu0 %1308 }
 0x3ed   : > { %v1311_v4 = vunpack.i.h.bf16 %v1309_v1  ;;  %v1310_v40 = vunpack.i.l.bf16 %v1309_v1 }
 0x3ef   : > { %v454_v59 = vsel %vm313_vm2, %v375_v37, %v1311_v4  ;;  %v453_v50 = vsel %vm313_vm2, %v373_v35, %v1310_v40 }
 0x3f0   : > { %v456_v5 = vpack.c.bf16 %v454_v59, %v454_v59  ;;  %v455_v8 = vpack.c.bf16 %v453_v50, %v453_v50 }
 0x3f2   : > { %459 = vst.msk [vmem:[#allocation3 + $0x4] sm:$0xf] %vm457_vm5, %v456_v5 }
 0x3f3   : > { %458 = vst.msk [vmem:[#allocation3] sm:$0xf] %vm457_vm5, %v455_v8 }
 0x3fc   : > { %v1294_v2 = vpop.permute.xlu1 %1293 }
 0x3fd   : > { %v1296_v13 = vunpack.i.h.bf16 %v1294_v2  ;;  %v1295_v46 = vunpack.i.l.bf16 %v1294_v2 }
 0x3ff   : > { %v609_v17 = vsel %vm313_vm2, %v529_v52, %v1295_v46  ;;  %v610_v7 = vsel %vm313_vm2, %v531_v16, %v1296_v13 }
 0x400   : > { %v611_v19 = vpack.c.bf16 %v609_v17, %v609_v17  ;;  %v612_v21 = vpack.c.bf16 %v610_v7, %v610_v7 }
 0x402   : > { %615 = vrot.lane.b32.xlu1 %v611_v19, %s1568_s24  ;;  %617 = vrot.lane.b32.xlu2 %v612_v21, %s1568_s24 }
 0x40a   : > { %v1299_v22 = vpop.permute.xlu2 %1298 }
 0x40b   : > { %v1300_v0 = vunpack.i.l.bf16 %v1299_v22  ;;  %v1301_v25 = vunpack.i.h.bf16 %v1299_v22 }
 0x412   : > { %v693_v61 = vpop.f32.mrf.mxu1 }
 0x413   : > { %v773_v39 = vsel %vm313_vm2, %v693_v61, %v1300_v0 }
 0x414   : > { %v775_v6 = vpack.c.bf16 %v773_v39, %v773_v39 }
 0x416   : > { %779 = vrot.lane.b32.xlu1 %v775_v6, %s1569_s23 }
 0x41a   : > { %v695_v14 = vpop.f32.mrf.mxu1 }
 0x41b   : > { %v774_v15 = vsel %vm313_vm2, %v695_v14, %v1301_v25 }
 0x41c   : > { %v776_v12 = vpack.c.bf16 %v774_v15, %v774_v15 }
 0x41e   : > { %781 = vrot.lane.b32.xlu2 %v776_v12, %s1569_s23 }
 0x422   : > { %v857_v26 = vpop.f32.mrf.mxu1 }
 0x42a   : > { %v859_v31 = vpop.f32.mrf.mxu1 }
 0x42d   : > { %v1304_v27 = vpop.permute.xlu2 %1303 }
 0x42e   : > { %v1306_v28 = vunpack.i.h.bf16 %v1304_v27  ;;  %v1305_v29 = vunpack.i.l.bf16 %v1304_v27 }
 0x430   : > { %v937_v33 = vsel %vm313_vm2, %v857_v26, %v1305_v29  ;;  %v938_v34 = vsel %vm313_vm2, %v859_v31, %v1306_v28 }
 0x431   : > { %v939_v11 = vpack.c.bf16 %v937_v33, %v937_v33  ;;  %v940_v24 = vpack.c.bf16 %v938_v34, %v938_v34 }
 0x433   : > { %943 = vrot.lane.b32.xlu1 %v939_v11, %s1570_s25  ;;  %945 = vrot.lane.b32.xlu0 %v940_v24, %s1570_s25  ;;  %s1487_s25 = scalar_lea.hbm %s1994_s4, 32 }
 0x434   : > { %p1489_p2 = scmp.lt.s32.totalorder %s1487_s25, %s1483_s19 }
 0x436   : > { %p1490_p9 = por %p1489_p2, %p1488_p11 }
 0x438   : > { %p1491_p10 = pnand %p1490_p9, %p1486_p8 }
 0x45c   : > { %v618_v20 = vpop.permute.xlu2 %617 }
 0x45d   : > { %623 = vst.msk [vmem:[#allocation3 + $0x4] sm:$0xf] %vm621_vm6, %v618_v20 }
 0x474   : > { %v616_v35 = vpop.permute.xlu1 %615 }
 0x475   : > { %622 = vst.msk [vmem:[#allocation3] sm:$0xf] %vm621_vm6, %v616_v35 }
 0x478   : > { %v782_v37 = vpop.permute.xlu2 %781 }
 0x479   : > { %787 = vst.msk [vmem:[#allocation3 + $0x4] sm:$0xf] %vm785_vm7, %v782_v37 }
 0x488   : > { %v780_v41 = vpop.permute.xlu1 %779 }
 0x489   : > { %786 = vst.msk [vmem:[#allocation3] sm:$0xf] %vm785_vm7, %v780_v41 }
 0x4a5   : > { %v944_v10 = vpop.permute.xlu1 %943  ;;  %v946_v42 = vpop.permute.xlu0 %945 }
 0x4a6   : > { %950 = vst.msk [vmem:[#allocation3] sm:$0xf] %vm949_vm8, %v944_v10 }
 0x4a7   : > { %951 = vst.msk [vmem:[#allocation3 + $0x4] sm:$0xf] %vm949_vm8, %v946_v42 }
 0x4ae   : > { %v1190_v43 = vld [vmem:[#allocation3] sm:$0xff] }
 0x4af   : > { %1176 = vmatmul.msk.bf16.vlgmr.msra.gmra.mxu0 %vm277_vm0, %v1190_v43 }
 0x52c   : > { %v991_v47 = vpop.f32.mrf.mxu0 }
 0x52d   : > { %v992_v3 = vadd.f32 %v1312_v45, %v991_v47 }
 0x52f   : > { %996 = vst.msk [vmem:[%s250_s12] sm:$0xff] %vm277_vm0, %v992_v3 }
 0x534   : > { %v993_v32 = vpop.f32.mrf.mxu0 }
 0x535   : > { %v994_v48 = vadd.f32 %v1312_v45, %v993_v32 }
 0x537   : > { %997 = vst.msk [vmem:[%s250_s12 + $0x8] sm:$0xff] %vm277_vm0, %v994_v48 }
 0x538   : > { %1494 = shalt.err (!%p1491_p10)
}
 0x539   : > { %s1571_s20 = smov 128  }
 0x53a   : > { %1204 = dma.vmem_to_hbm [thread:$0]  (%p1669_p3), %s1012_s7, 256, %s1014_s30, %s999_s5, %s1571_s20, %s1571_s20, %s1568_s24  }
 0x53b PF: > { %s1028_s29 = sand.u32 1, %s1525_s15   ;;  %p2000_p12 = scmp.ge.s32.totalorder %s1537_s18, 2 }
 0x53c   : > { %s1029_s11 = scalar_lea.sflag [#allocation6], %s1028_s29 }
 0x53d   : > { %p1218_p13 = pnand %p2000_p12, %p1632_p6 }
 0x53f   : > { %p1219_p0 = pneg %p1218_p13 }
 0x541   : > { %1520 = dma.done.wait (%p1219_p0), %s1029_s11, 256  }
 0x542   : > { %1522 = vsyncadd (%p1219_p0), %s1029_s11, 4294967040  ;;  %p18_p5 = scmp.ge.s32.totalorder %s1659_s10, 4   ;;  %s2001_s15 = smov %s1529_s16 }
 0x543   : > { %s2002_s16 = smov %s1533_s17  ;;  %s2003_s17 = smov %s1675_s14 }
 0x544   : > { %s2004_s18 = smov %s1659_s10  ;;  %20 = sbr.rel (!%p18_p5) target bundleno = 6 (0x6), region = 89 }
 0x549   :  { %1035 = vsyncpa [#allocation5], 1 }
 0x54a   :  { %1037 = vsyncpa [#allocation5 + $0x1], 1 }
 0x54b   :  { %1038 = vsyncpa [#allocation8], 1 }
 0x54c   :  { %1039 = vsyncpa [#allocation6], 1 }
 0x54d   :  { %1041 = vsyncpa [#allocation6 + $0x1], 1 }

</bundles_post_ra>
